<compile_context>
chip_gen: v7x
topology: tpu7x:2x2x1
jax: 0.10.0
libtpu: 0.0.40
codegen_flags: <defaults>
</compile_context>

<pallas_src>
import functools

import jax
import jax.numpy as jnp
from jax import lax
from jax.experimental import pallas as pl
from jax.experimental.pallas import tpu as pltpu

INPUT_SIZE = 10        # n_piles
INPUT_PAD = 16         # padded input width (zero cols; multiple of 8)
HIDDEN_SIZE = 128
ACTION_SIZE = 16
HEAD_WIDTH = 128       # fused head output: [policy(16) | value(1) | zero pad]
T_CHUNK_MAX = 8        # timesteps per grid step (bounded unroll / VMEM)


def _ceil_to(n, m):
    return ((n + m - 1) // m) * m


def _cdiv(a, b):
    return -(-a // b)


def _nim_kernel(x_ref, wih_ref, whh_ref, b_ref, wh_ref, bh_ref, out_ref,
                h_ref, c_ref, *, n_frames):
    """LSTM recurrence over one (batch_tile, time_chunk) grid cell + fused head.

    Grid: (batch_tiles, time_chunks); time axis is "arbitrary".  h/c persist in
    VMEM scratch across time chunks and are re-zeroed at t == 0 per batch tile.

    x_ref   : (T_chunk, tile_b, INPUT_PAD) f32  raw inputs (time-major, 0-padded)
    wih_ref : (INPUT_PAD, 4H) f32   input weights (transposed, zero pad rows)
    whh_ref : (H, 4H)         f32   recurrent weights (transposed, gates i,f,g,o)
    b_ref   : (1, 4H)         f32   b_ih + b_hh
    wh_ref  : (H, 128)        f32   fused head weights [policy | value | 0]
    bh_ref  : (1, 128)        f32   fused head bias    [policy | value | 0]
    out_ref : (tile_b, 128)   f32   lanes 0..15 = softmax(policy), lane 16 = tanh(value)
    h_ref, c_ref : (tile_b, H) f32  persistent VMEM scratch
    """
    t_chunk = x_ref.shape[0]
    hidden = whh_ref.shape[0]
    t_idx = pl.program_id(1)
    n_t = pl.num_programs(1)

    @pl.when(t_idx == 0)
    def _():
        h_ref[...] = jnp.zeros_like(h_ref)
        c_ref[...] = jnp.zeros_like(c_ref)

    base_t = t_idx * t_chunk
    has_tail = (n_frames % t_chunk) != 0   # static at trace time

    def sig(v):
        # sigmoid(x) = 0.5*tanh(0.5*x) + 0.5  -> 1 EUP push + cheap VPU ops.
        return 0.5 * jnp.tanh(0.5 * v) + 0.5

    def step(t, carry):
        h, c = carry
        # Input projection fused into the recurrence; it is independent of h
        # so it hides under the EUP-bound gate nonlinearities (MXU has slack).
        gates = (jnp.dot(x_ref[t], wih_ref[...],
                         preferred_element_type=jnp.float32)
                 + jnp.dot(h, whh_ref[...],
                           preferred_element_type=jnp.float32)
                 + b_ref[...])                                   # (B, 4H) f32
        i_g = sig(gates[:, 0 * hidden:1 * hidden])
        f_g = sig(gates[:, 1 * hidden:2 * hidden])
        g_g = jnp.tanh(gates[:, 2 * hidden:3 * hidden])
        o_g = sig(gates[:, 3 * hidden:4 * hidden])
        c_new = f_g * c + i_g * g_g
        h_new = o_g * jnp.tanh(c_new)
        if has_tail:
            # Mask updates for zero-padded timesteps past the true seq length.
            keep = ((base_t + t) < n_frames).astype(jnp.float32)
            h_new = keep * h_new + (1.0 - keep) * h
            c_new = keep * c_new + (1.0 - keep) * c
        return (h_new, c_new)

    # Bounded unroll (t_chunk <= 8): LLO can interleave across steps without
    # blowing the vreg file / compile time for long sequences.
    h, c = lax.fori_loop(0, t_chunk, step, (h_ref[...], c_ref[...]),
                         unroll=True)
    h_ref[...] = h
    c_ref[...] = c

    @pl.when(t_idx == n_t - 1)
    def _():
        # Fused head: one MXU matmul, one lane-dense (B, 128) unmasked store.
        ho = jnp.dot(h, wh_ref[...],
                     preferred_element_type=jnp.float32) + bh_ref[...]
        col = lax.broadcasted_iota(jnp.int32, ho.shape, 1)
        is_policy = col < ACTION_SIZE
        masked = jnp.where(is_policy, ho, -1e30)
        m = jnp.max(masked, axis=-1, keepdims=True)
        e = jnp.exp(masked - m)
        policy = e / jnp.sum(e, axis=-1, keepdims=True)
        value = jnp.tanh(ho)
        out_ref[...] = jnp.where(is_policy, policy,
                                 jnp.where(col == ACTION_SIZE, value, 0.0))


@jax.jit
def nim_forward(x, params):
    """x: (batch, total_seq_len) f32 -> (policy (B, A), value (B, 1))."""
    batch, total_seq_len = x.shape
    assert total_seq_len % INPUT_SIZE == 0
    n_frames = total_seq_len // INPUT_SIZE
    h4 = 4 * HIDDEN_SIZE

    # Batch tiling: >= 2 tiles whenever batch >= 16 (use both v7x TCs) while
    # keeping padding waste small for non-multiple batches.
    if batch >= 16:
        n_b_tiles = max(2, _cdiv(batch, 256))
        tile_b = min(256, _ceil_to(_cdiv(batch, n_b_tiles), 8))
    else:
        tile_b = _ceil_to(batch, 8)
    b_pad = _ceil_to(batch, tile_b)

    # Time chunking: bounded VMEM per grid step, pipelined x DMA.
    t_chunk = min(n_frames, T_CHUNK_MAX)
    n_t = _cdiv(n_frames, t_chunk)
    t_pad = n_t * t_chunk

    # Raw x, time-major, zero-padded (pad timesteps masked in-kernel, pad
    # input cols hit zero weight rows, pad batch rows are discarded).
    x3 = x.reshape(batch, n_frames, INPUT_SIZE).transpose(1, 0, 2)  # (T,B,I)
    x3 = jnp.pad(x3, ((0, t_pad - n_frames),
                      (0, b_pad - batch),
                      (0, INPUT_PAD - INPUT_SIZE)))

    kernel = functools.partial(_nim_kernel, n_frames=n_frames)

    grid_spec = pltpu.PrefetchScalarGridSpec(
        num_scalar_prefetch=0,
        grid=(b_pad // tile_b, n_t),
        in_specs=[
            pl.BlockSpec((t_chunk, tile_b, INPUT_PAD), lambda b, t: (t, b, 0)),
            pl.BlockSpec((INPUT_PAD, h4), lambda b, t: (0, 0)),
            pl.BlockSpec((HIDDEN_SIZE, h4), lambda b, t: (0, 0)),
            pl.BlockSpec((1, h4), lambda b, t: (0, 0)),
            pl.BlockSpec((HIDDEN_SIZE, HEAD_WIDTH), lambda b, t: (0, 0)),
            pl.BlockSpec((1, HEAD_WIDTH), lambda b, t: (0, 0)),
        ],
        out_specs=pl.BlockSpec((tile_b, HEAD_WIDTH), lambda b, t: (b, 0)),
        scratch_shapes=[
            pltpu.VMEM((tile_b, HIDDEN_SIZE), jnp.float32),   # h
            pltpu.VMEM((tile_b, HIDDEN_SIZE), jnp.float32),   # c
        ],
    )

    fused = pl.pallas_call(
        kernel,
        out_shape=jax.ShapeDtypeStruct((b_pad, HEAD_WIDTH), jnp.float32),
        grid_spec=grid_spec,
        compiler_params=pltpu.CompilerParams(
            dimension_semantics=("parallel", "arbitrary")),
    )(x3, params["w_ih_t"], params["w_hh_t"], params["b_lstm"],
      params["w_head"], params["b_head"])

    policy = fused[:batch, :ACTION_SIZE]
    value = fused[:batch, ACTION_SIZE:ACTION_SIZE + 1]
    return policy, value


def init_params(key):
    """Deterministic init matching PyTorch parameter shapes (uniform +-1/sqrt(H))."""
    h, i, a = HIDDEN_SIZE, INPUT_SIZE, ACTION_SIZE
    bound = 1.0 / jnp.sqrt(jnp.float32(h))
    ks = jax.random.split(key, 8)

    def u(k, shape):
        return jax.random.uniform(k, shape, jnp.float32, -bound, bound)

    w_ih = u(ks[0], (4 * h, i))     # torch: lstm.weight_ih_l0
    w_hh = u(ks[1], (4 * h, h))     # torch: lstm.weight_hh_l0
    b_ih = u(ks[2], (4 * h,))
    b_hh = u(ks[3], (4 * h,))
    w_p = u(ks[4], (a, h))          # policy_head[-1].weight
    b_p = u(ks[5], (a,))
    w_v = u(ks[6], (1, h))          # value_head[-1].weight
    b_v = u(ks[7], (1,))

    # Input weights transposed + zero-padded to INPUT_PAD rows.
    w_ih_t = jnp.zeros((INPUT_PAD, 4 * h), jnp.float32).at[:i, :].set(w_ih.T)

    pad = HEAD_WIDTH - a - 1
    w_head = jnp.concatenate(
        [w_p.T, w_v.T, jnp.zeros((h, pad), jnp.float32)], axis=1)  # (H, 128)
    b_head = jnp.concatenate(
        [b_p, b_v, jnp.zeros((pad,), jnp.float32)]).reshape(1, HEAD_WIDTH)

    return {
        "w_ih_t": w_ih_t,                               # (INPUT_PAD, 4H)
        "w_hh_t": w_hh.T,                               # (H, 4H)
        "b_lstm": (b_ih + b_hh).reshape(1, 4 * h),      # (1, 4H)
        "w_head": w_head,                               # (H, 128)
        "b_head": b_head,                               # (1, 128)
    }


def _reference_forward(x, params):
    """Pure-JAX f32 reference of the PyTorch forward (for sanity check)."""
    batch, total = x.shape
    n_frames = total // INPUT_SIZE
    H = HIDDEN_SIZE
    w_ih_t = params["w_ih_t"][:INPUT_SIZE, :]
    xs = x.reshape(batch, n_frames, INPUT_SIZE)
    h = jnp.zeros((batch, H), jnp.float32)
    c = jnp.zeros((batch, H), jnp.float32)
    for t in range(n_frames):
        gates = xs[:, t, :] @ w_ih_t + h @ params["w_hh_t"] + params["b_lstm"]
        i_g = jax.nn.sigmoid(gates[:, 0 * H:1 * H])
        f_g = jax.nn.sigmoid(gates[:, 1 * H:2 * H])
        g_g = jnp.tanh(gates[:, 2 * H:3 * H])
        o_g = jax.nn.sigmoid(gates[:, 3 * H:4 * H])
        c = f_g * c + i_g * g_g
        h = o_g * jnp.tanh(c)
    w_p = params["w_head"][:, :ACTION_SIZE]
    b_p = params["b_head"][:, :ACTION_SIZE]
    w_v = params["w_head"][:, ACTION_SIZE:ACTION_SIZE + 1]
    b_v = params["b_head"][:, ACTION_SIZE:ACTION_SIZE + 1]
    policy = jax.nn.softmax(h @ w_p + b_p, axis=-1)
    value = jnp.tanh(h @ w_v + b_v)
    return policy, value


def _check(x, params):
    policy, value = nim_forward(x, params)
    jax.block_until_ready((policy, value))
    ref_policy, ref_value = _reference_forward(x, params)
    batch = x.shape[0]
    assert policy.shape == (batch, ACTION_SIZE)
    assert value.shape == (batch, 1)
    assert jnp.allclose(policy, ref_policy, atol=2e-2)
    assert jnp.allclose(value, ref_value, atol=2e-2)
    assert jnp.allclose(jnp.sum(policy, axis=-1), 1.0, atol=1e-5)


if __name__ == "__main__":
    key = jax.random.PRNGKey(0)
    k_param, k_x1, k_x2 = jax.random.split(key, 3)

    params = init_params(k_param)

    # Small case: batch=2, n_frames=8 (total_seq_len=80); grid=(1, 1).
    x_small = jax.random.uniform(k_x1, (2, 8 * INPUT_SIZE), jnp.float32, 0.0, 5.0)
    _check(x_small, params)

    # Multi-tile / ragged-time case: batch=20, n_frames=11 -> 2 batch tiles,
    # 2 time chunks with in-kernel tail masking.
    x_mid = jax.random.uniform(k_x2, (20, 11 * INPUT_SIZE), jnp.float32, 0.0, 5.0)
    _check(x_mid, params)

    print("KERNEL_OK")
</pallas_src>

<mosaic_0001>
module attributes {stable_mosaic.version = 11 : i64} {
  func.func @_nim_kernel(%arg0: i32, %arg1: i32, %arg2: memref<8x8x16xf32, #tpu.memory_space<vmem>>, %arg3: memref<16x512xf32, #tpu.memory_space<vmem>>, %arg4: memref<128x512xf32, #tpu.memory_space<vmem>>, %arg5: memref<1x512xf32, #tpu.memory_space<vmem>>, %arg6: memref<128x128xf32, #tpu.memory_space<vmem>>, %arg7: memref<1x128xf32, #tpu.memory_space<vmem>>, %arg8: memref<8x128xf32, #tpu.memory_space<vmem>>, %arg9: memref<8x128xf32, #tpu.memory_space<vmem>>, %arg10: memref<8x128xf32, #tpu.memory_space<vmem>>) attributes {dimension_semantics = [#tpu.dimension_semantics<parallel>, #tpu.dimension_semantics<arbitrary>], iteration_bounds = array<i64: 1, 1>, scalar_prefetch = 0 : i64, scratch_operands = 2 : i64, tpu.core_type = #tpu.core_type<tc>, window_params = [{transform_indices = @transform_0, window_bounds = array<i64: 8, 8, 16>}, {pipeline_mode = #tpu.pipeline_mode<synchronous>, transform_indices = @transform_1, window_bounds = array<i64: 16, 512>}, {pipeline_mode = #tpu.pipeline_mode<synchronous>, transform_indices = @transform_2, window_bounds = array<i64: 128, 512>}, {pipeline_mode = #tpu.pipeline_mode<synchronous>, transform_indices = @transform_3, window_bounds = array<i64: 1, 512>}, {pipeline_mode = #tpu.pipeline_mode<synchronous>, transform_indices = @transform_4, window_bounds = array<i64: 128, 128>}, {pipeline_mode = #tpu.pipeline_mode<synchronous>, transform_indices = @transform_5, window_bounds = array<i64: 1, 128>}, {transform_indices = @transform_6, window_bounds = array<i64: 8, 128>}]} {
    %c0_i32 = arith.constant 0 : i32
    %0 = arith.cmpi eq, %arg1, %c0_i32 : i32
    %1 = arith.extui %0 : i1 to i32
    %c0_i32_0 = arith.constant 0 : i32
    %2 = arith.cmpi ne, %1, %c0_i32_0 : i32
    scf.if %2 {
      %cst_162 = arith.constant 0.000000e+00 : f32
      %346 = vector.broadcast %cst_162 : f32 to vector<8x128xf32>
      %c0_163 = arith.constant 0 : index
      %c0_164 = arith.constant 0 : index
      %347 = vector.load %arg9[%c0_163, %c0_164] : memref<8x128xf32, #tpu.memory_space<vmem>>, vector<8x128xf32>
      tpu.vector_store %arg9[%c0_163, %c0_164], %346 {strides = array<i32>} : memref<8x128xf32, #tpu.memory_space<vmem>>, vector<8x128xf32>,
      %cst_165 = arith.constant 0.000000e+00 : f32
      %348 = vector.broadcast %cst_165 : f32 to vector<8x128xf32>
      %c0_166 = arith.constant 0 : index
      %c0_167 = arith.constant 0 : index
      %349 = vector.load %arg10[%c0_166, %c0_167] : memref<8x128xf32, #tpu.memory_space<vmem>>, vector<8x128xf32>
      tpu.vector_store %arg10[%c0_166, %c0_167], %348 {strides = array<i32>} : memref<8x128xf32, #tpu.memory_space<vmem>>, vector<8x128xf32>,
    } else {
    }
    %c0 = arith.constant 0 : index
    %c0_1 = arith.constant 0 : index
    %3 = vector.load %arg9[%c0, %c0_1] : memref<8x128xf32, #tpu.memory_space<vmem>>, vector<8x128xf32>
    %c0_2 = arith.constant 0 : index
    %c0_3 = arith.constant 0 : index
    %4 = vector.load %arg10[%c0_2, %c0_3] : memref<8x128xf32, #tpu.memory_space<vmem>>, vector<8x128xf32>
    %c0_i32_4 = arith.constant 0 : i32
    %5 = arith.index_cast %c0_i32_4 : i32 to index
    %c0_5 = arith.constant 0 : index
    %c0_6 = arith.constant 0 : index
    %6 = vector.load %arg2[%5, %c0_5, %c0_6] : memref<8x8x16xf32, #tpu.memory_space<vmem>>, vector<1x8x16xf32>
    %7 = vector.shape_cast %6 : vector<1x8x16xf32> to vector<8x16xf32>
    %c0_7 = arith.constant 0 : index
    %c0_8 = arith.constant 0 : index
    %8 = vector.load %arg3[%c0_7, %c0_8] : memref<16x512xf32, #tpu.memory_space<vmem>>, vector<16x512xf32>
    %cst = arith.constant dense<0.000000e+00> : vector<8x512xf32>
    %9 = tpu.matmul %7, %8, %cst {dimension_numbers = #tpu.dot_dimension_numbers<[1], [0], [0], [1], [0, 0, 1, 1], [], []>} : vector<8x16xf32>, vector<16x512xf32>, vector<8x512xf32> -> vector<8x512xf32>
    %c0_9 = arith.constant 0 : index
    %c0_10 = arith.constant 0 : index
    %10 = vector.load %arg4[%c0_9, %c0_10] : memref<128x512xf32, #tpu.memory_space<vmem>>, vector<128x512xf32>
    %cst_11 = arith.constant dense<0.000000e+00> : vector<8x512xf32>
    %11 = tpu.matmul %3, %10, %cst_11 {dimension_numbers = #tpu.dot_dimension_numbers<[1], [0], [0], [1], [0, 0, 1, 1], [], []>} : vector<8x128xf32>, vector<128x512xf32>, vector<8x512xf32> -> vector<8x512xf32>
    %12 = arith.addf %9, %11 : vector<8x512xf32>
    %c0_12 = arith.constant 0 : index
    %c0_13 = arith.constant 0 : index
    %13 = vector.load %arg5[%c0_12, %c0_13] : memref<1x512xf32, #tpu.memory_space<vmem>>, vector<1x512xf32>
    %14 = vector.broadcast %13 : vector<1x512xf32> to vector<8x512xf32>
    %15 = arith.addf %12, %14 : vector<8x512xf32>
    %16 = vector.extract_strided_slice %15 {offsets = [0, 0], sizes = [8, 128], strides = [1, 1]} : vector<8x512xf32> to vector<8x128xf32>
    %cst_14 = arith.constant 5.000000e-01 : f32
    %17 = vector.broadcast %cst_14 : f32 to vector<8x128xf32>
    %18 = arith.mulf %17, %16 : vector<8x128xf32>
    %19 = math.tanh %18 : vector<8x128xf32>
    %cst_15 = arith.constant 5.000000e-01 : f32
    %20 = vector.broadcast %cst_15 : f32 to vector<8x128xf32>
    %21 = arith.mulf %20, %19 : vector<8x128xf32>
    %cst_16 = arith.constant 5.000000e-01 : f32
    %22 = vector.broadcast %cst_16 : f32 to vector<8x128xf32>
    %23 = arith.addf %21, %22 : vector<8x128xf32>
    %24 = vector.extract_strided_slice %15 {offsets = [0, 128], sizes = [8, 128], strides = [1, 1]} : vector<8x512xf32> to vector<8x128xf32>
    %cst_17 = arith.constant 5.000000e-01 : f32
    %25 = vector.broadcast %cst_17 : f32 to vector<8x128xf32>
    %26 = arith.mulf %25, %24 : vector<8x128xf32>
    %27 = math.tanh %26 : vector<8x128xf32>
    %cst_18 = arith.constant 5.000000e-01 : f32
    %28 = vector.broadcast %cst_18 : f32 to vector<8x128xf32>
    %29 = arith.mulf %28, %27 : vector<8x128xf32>
    %cst_19 = arith.constant 5.000000e-01 : f32
    %30 = vector.broadcast %cst_19 : f32 to vector<8x128xf32>
    %31 = arith.addf %29, %30 : vector<8x128xf32>
    %32 = vector.extract_strided_slice %15 {offsets = [0, 256], sizes = [8, 128], strides = [1, 1]} : vector<8x512xf32> to vector<8x128xf32>
    %33 = math.tanh %32 : vector<8x128xf32>
    %34 = vector.extract_strided_slice %15 {offsets = [0, 384], sizes = [8, 128], strides = [1, 1]} : vector<8x512xf32> to vector<8x128xf32>
    %cst_20 = arith.constant 5.000000e-01 : f32
    %35 = vector.broadcast %cst_20 : f32 to vector<8x128xf32>
    %36 = arith.mulf %35, %34 : vector<8x128xf32>
    %37 = math.tanh %36 : vector<8x128xf32>
    %cst_21 = arith.constant 5.000000e-01 : f32
    %38 = vector.broadcast %cst_21 : f32 to vector<8x128xf32>
    %39 = arith.mulf %38, %37 : vector<8x128xf32>
    %cst_22 = arith.constant 5.000000e-01 : f32
    %40 = vector.broadcast %cst_22 : f32 to vector<8x128xf32>
    %41 = arith.addf %39, %40 : vector<8x128xf32>
    %42 = arith.mulf %31, %4 : vector<8x128xf32>
    %43 = arith.mulf %23, %33 : vector<8x128xf32>
    %44 = arith.addf %42, %43 : vector<8x128xf32>
    %45 = math.tanh %44 : vector<8x128xf32>
    %46 = arith.mulf %41, %45 : vector<8x128xf32>
    %c1_i32 = arith.constant 1 : i32
    %47 = arith.index_cast %c1_i32 : i32 to index
    %c0_23 = arith.constant 0 : index
    %c0_24 = arith.constant 0 : index
    %48 = vector.load %arg2[%47, %c0_23, %c0_24] : memref<8x8x16xf32, #tpu.memory_space<vmem>>, vector<1x8x16xf32>
    %49 = vector.shape_cast %48 : vector<1x8x16xf32> to vector<8x16xf32>
    %c0_25 = arith.constant 0 : index
    %c0_26 = arith.constant 0 : index
    %50 = vector.load %arg3[%c0_25, %c0_26] : memref<16x512xf32, #tpu.memory_space<vmem>>, vector<16x512xf32>
    %cst_27 = arith.constant dense<0.000000e+00> : vector<8x512xf32>
    %51 = tpu.matmul %49, %50, %cst_27 {dimension_numbers = #tpu.dot_dimension_numbers<[1], [0], [0], [1], [0, 0, 1, 1], [], []>} : vector<8x16xf32>, vector<16x512xf32>, vector<8x512xf32> -> vector<8x512xf32>
    %c0_28 = arith.constant 0 : index
    %c0_29 = arith.constant 0 : index
    %52 = vector.load %arg4[%c0_28, %c0_29] : memref<128x512xf32, #tpu.memory_space<vmem>>, vector<128x512xf32>
    %cst_30 = arith.constant dense<0.000000e+00> : vector<8x512xf32>
    %53 = tpu.matmul %46, %52, %cst_30 {dimension_numbers = #tpu.dot_dimension_numbers<[1], [0], [0], [1], [0, 0, 1, 1], [], []>} : vector<8x128xf32>, vector<128x512xf32>, vector<8x512xf32> -> vector<8x512xf32>
    %54 = arith.addf %51, %53 : vector<8x512xf32>
    %c0_31 = arith.constant 0 : index
    %c0_32 = arith.constant 0 : index
    %55 = vector.load %arg5[%c0_31, %c0_32] : memref<1x512xf32, #tpu.memory_space<vmem>>, vector<1x512xf32>
    %56 = vector.broadcast %55 : vector<1x512xf32> to vector<8x512xf32>
    %57 = arith.addf %54, %56 : vector<8x512xf32>
    %58 = vector.extract_strided_slice %57 {offsets = [0, 0], sizes = [8, 128], strides = [1, 1]} : vector<8x512xf32> to vector<8x128xf32>
    %cst_33 = arith.constant 5.000000e-01 : f32
    %59 = vector.broadcast %cst_33 : f32 to vector<8x128xf32>
    %60 = arith.mulf %59, %58 : vector<8x128xf32>
    %61 = math.tanh %60 : vector<8x128xf32>
    %cst_34 = arith.constant 5.000000e-01 : f32
    %62 = vector.broadcast %cst_34 : f32 to vector<8x128xf32>
    %63 = arith.mulf %62, %61 : vector<8x128xf32>
    %cst_35 = arith.constant 5.000000e-01 : f32
    %64 = vector.broadcast %cst_35 : f32 to vector<8x128xf32>
    %65 = arith.addf %63, %64 : vector<8x128xf32>
    %66 = vector.extract_strided_slice %57 {offsets = [0, 128], sizes = [8, 128], strides = [1, 1]} : vector<8x512xf32> to vector<8x128xf32>
    %cst_36 = arith.constant 5.000000e-01 : f32
    %67 = vector.broadcast %cst_36 : f32 to vector<8x128xf32>
    %68 = arith.mulf %67, %66 : vector<8x128xf32>
    %69 = math.tanh %68 : vector<8x128xf32>
    %cst_37 = arith.constant 5.000000e-01 : f32
    %70 = vector.broadcast %cst_37 : f32 to vector<8x128xf32>
    %71 = arith.mulf %70, %69 : vector<8x128xf32>
    %cst_38 = arith.constant 5.000000e-01 : f32
    %72 = vector.broadcast %cst_38 : f32 to vector<8x128xf32>
    %73 = arith.addf %71, %72 : vector<8x128xf32>
    %74 = vector.extract_strided_slice %57 {offsets = [0, 256], sizes = [8, 128], strides = [1, 1]} : vector<8x512xf32> to vector<8x128xf32>
    %75 = math.tanh %74 : vector<8x128xf32>
    %76 = vector.extract_strided_slice %57 {offsets = [0, 384], sizes = [8, 128], strides = [1, 1]} : vector<8x512xf32> to vector<8x128xf32>
    %cst_39 = arith.constant 5.000000e-01 : f32
    %77 = vector.broadcast %cst_39 : f32 to vector<8x128xf32>
    %78 = arith.mulf %77, %76 : vector<8x128xf32>
    %79 = math.tanh %78 : vector<8x128xf32>
    %cst_40 = arith.constant 5.000000e-01 : f32
    %80 = vector.broadcast %cst_40 : f32 to vector<8x128xf32>
    %81 = arith.mulf %80, %79 : vector<8x128xf32>
    %cst_41 = arith.constant 5.000000e-01 : f32
    %82 = vector.broadcast %cst_41 : f32 to vector<8x128xf32>
    %83 = arith.addf %81, %82 : vector<8x128xf32>
    %84 = arith.mulf %73, %44 : vector<8x128xf32>
    %85 = arith.mulf %65, %75 : vector<8x128xf32>
    %86 = arith.addf %84, %85 : vector<8x128xf32>
    %87 = math.tanh %86 : vector<8x128xf32>
    %88 = arith.mulf %83, %87 : vector<8x128xf32>
    %c2_i32 = arith.constant 2 : i32
    %89 = arith.index_cast %c2_i32 : i32 to index
    %c0_42 = arith.constant 0 : index
    %c0_43 = arith.constant 0 : index
    %90 = vector.load %arg2[%89, %c0_42, %c0_43] : memref<8x8x16xf32, #tpu.memory_space<vmem>>, vector<1x8x16xf32>
    %91 = vector.shape_cast %90 : vector<1x8x16xf32> to vector<8x16xf32>
    %c0_44 = arith.constant 0 : index
    %c0_45 = arith.constant 0 : index
    %92 = vector.load %arg3[%c0_44, %c0_45] : memref<16x512xf32, #tpu.memory_space<vmem>>, vector<16x512xf32>
    %cst_46 = arith.constant dense<0.000000e+00> : vector<8x512xf32>
    %93 = tpu.matmul %91, %92, %cst_46 {dimension_numbers = #tpu.dot_dimension_numbers<[1], [0], [0], [1], [0, 0, 1, 1], [], []>} : vector<8x16xf32>, vector<16x512xf32>, vector<8x512xf32> -> vector<8x512xf32>
    %c0_47 = arith.constant 0 : index
    %c0_48 = arith.constant 0 : index
    %94 = vector.load %arg4[%c0_47, %c0_48] : memref<128x512xf32, #tpu.memory_space<vmem>>, vector<128x512xf32>
    %cst_49 = arith.constant dense<0.000000e+00> : vector<8x512xf32>
    %95 = tpu.matmul %88, %94, %cst_49 {dimension_numbers = #tpu.dot_dimension_numbers<[1], [0], [0], [1], [0, 0, 1, 1], [], []>} : vector<8x128xf32>, vector<128x512xf32>, vector<8x512xf32> -> vector<8x512xf32>
    %96 = arith.addf %93, %95 : vector<8x512xf32>
    %c0_50 = arith.constant 0 : index
    %c0_51 = arith.constant 0 : index
    %97 = vector.load %arg5[%c0_50, %c0_51] : memref<1x512xf32, #tpu.memory_space<vmem>>, vector<1x512xf32>
    %98 = vector.broadcast %97 : vector<1x512xf32> to vector<8x512xf32>
    %99 = arith.addf %96, %98 : vector<8x512xf32>
    %100 = vector.extract_strided_slice %99 {offsets = [0, 0], sizes = [8, 128], strides = [1, 1]} : vector<8x512xf32> to vector<8x128xf32>
    %cst_52 = arith.constant 5.000000e-01 : f32
    %101 = vector.broadcast %cst_52 : f32 to vector<8x128xf32>
    %102 = arith.mulf %101, %100 : vector<8x128xf32>
    %103 = math.tanh %102 : vector<8x128xf32>
    %cst_53 = arith.constant 5.000000e-01 : f32
    %104 = vector.broadcast %cst_53 : f32 to vector<8x128xf32>
    %105 = arith.mulf %104, %103 : vector<8x128xf32>
    %cst_54 = arith.constant 5.000000e-01 : f32
    %106 = vector.broadcast %cst_54 : f32 to vector<8x128xf32>
    %107 = arith.addf %105, %106 : vector<8x128xf32>
    %108 = vector.extract_strided_slice %99 {offsets = [0, 128], sizes = [8, 128], strides = [1, 1]} : vector<8x512xf32> to vector<8x128xf32>
    %cst_55 = arith.constant 5.000000e-01 : f32
    %109 = vector.broadcast %cst_55 : f32 to vector<8x128xf32>
    %110 = arith.mulf %109, %108 : vector<8x128xf32>
    %111 = math.tanh %110 : vector<8x128xf32>
    %cst_56 = arith.constant 5.000000e-01 : f32
    %112 = vector.broadcast %cst_56 : f32 to vector<8x128xf32>
    %113 = arith.mulf %112, %111 : vector<8x128xf32>
    %cst_57 = arith.constant 5.000000e-01 : f32
    %114 = vector.broadcast %cst_57 : f32 to vector<8x128xf32>
    %115 = arith.addf %113, %114 : vector<8x128xf32>
    %116 = vector.extract_strided_slice %99 {offsets = [0, 256], sizes = [8, 128], strides = [1, 1]} : vector<8x512xf32> to vector<8x128xf32>
    %117 = math.tanh %116 : vector<8x128xf32>
    %118 = vector.extract_strided_slice %99 {offsets = [0, 384], sizes = [8, 128], strides = [1, 1]} : vector<8x512xf32> to vector<8x128xf32>
    %cst_58 = arith.constant 5.000000e-01 : f32
    %119 = vector.broadcast %cst_58 : f32 to vector<8x128xf32>
    %120 = arith.mulf %119, %118 : vector<8x128xf32>
    %121 = math.tanh %120 : vector<8x128xf32>
    %cst_59 = arith.constant 5.000000e-01 : f32
    %122 = vector.broadcast %cst_59 : f32 to vector<8x128xf32>
    %123 = arith.mulf %122, %121 : vector<8x128xf32>
    %cst_60 = arith.constant 5.000000e-01 : f32
    %124 = vector.broadcast %cst_60 : f32 to vector<8x128xf32>
    %125 = arith.addf %123, %124 : vector<8x128xf32>
    %126 = arith.mulf %115, %86 : vector<8x128xf32>
    %127 = arith.mulf %107, %117 : vector<8x128xf32>
    %128 = arith.addf %126, %127 : vector<8x128xf32>
    %129 = math.tanh %128 : vector<8x128xf32>
    %130 = arith.mulf %125, %129 : vector<8x128xf32>
    %c3_i32 = arith.constant 3 : i32
    %131 = arith.index_cast %c3_i32 : i32 to index
    %c0_61 = arith.constant 0 : index
    %c0_62 = arith.constant 0 : index
    %132 = vector.load %arg2[%131, %c0_61, %c0_62] : memref<8x8x16xf32, #tpu.memory_space<vmem>>, vector<1x8x16xf32>
    %133 = vector.shape_cast %132 : vector<1x8x16xf32> to vector<8x16xf32>
    %c0_63 = arith.constant 0 : index
    %c0_64 = arith.constant 0 : index
    %134 = vector.load %arg3[%c0_63, %c0_64] : memref<16x512xf32, #tpu.memory_space<vmem>>, vector<16x512xf32>
    %cst_65 = arith.constant dense<0.000000e+00> : vector<8x512xf32>
    %135 = tpu.matmul %133, %134, %cst_65 {dimension_numbers = #tpu.dot_dimension_numbers<[1], [0], [0], [1], [0, 0, 1, 1], [], []>} : vector<8x16xf32>, vector<16x512xf32>, vector<8x512xf32> -> vector<8x512xf32>
    %c0_66 = arith.constant 0 : index
    %c0_67 = arith.constant 0 : index
    %136 = vector.load %arg4[%c0_66, %c0_67] : memref<128x512xf32, #tpu.memory_space<vmem>>, vector<128x512xf32>
    %cst_68 = arith.constant dense<0.000000e+00> : vector<8x512xf32>
    %137 = tpu.matmul %130, %136, %cst_68 {dimension_numbers = #tpu.dot_dimension_numbers<[1], [0], [0], [1], [0, 0, 1, 1], [], []>} : vector<8x128xf32>, vector<128x512xf32>, vector<8x512xf32> -> vector<8x512xf32>
    %138 = arith.addf %135, %137 : vector<8x512xf32>
    %c0_69 = arith.constant 0 : index
    %c0_70 = arith.constant 0 : index
    %139 = vector.load %arg5[%c0_69, %c0_70] : memref<1x512xf32, #tpu.memory_space<vmem>>, vector<1x512xf32>
    %140 = vector.broadcast %139 : vector<1x512xf32> to vector<8x512xf32>
    %141 = arith.addf %138, %140 : vector<8x512xf32>
    %142 = vector.extract_strided_slice %141 {offsets = [0, 0], sizes = [8, 128], strides = [1, 1]} : vector<8x512xf32> to vector<8x128xf32>
    %cst_71 = arith.constant 5.000000e-01 : f32
    %143 = vector.broadcast %cst_71 : f32 to vector<8x128xf32>
    %144 = arith.mulf %143, %142 : vector<8x128xf32>
    %145 = math.tanh %144 : vector<8x128xf32>
    %cst_72 = arith.constant 5.000000e-01 : f32
    %146 = vector.broadcast %cst_72 : f32 to vector<8x128xf32>
    %147 = arith.mulf %146, %145 : vector<8x128xf32>
    %cst_73 = arith.constant 5.000000e-01 : f32
    %148 = vector.broadcast %cst_73 : f32 to vector<8x128xf32>
    %149 = arith.addf %147, %148 : vector<8x128xf32>
    %150 = vector.extract_strided_slice %141 {offsets = [0, 128], sizes = [8, 128], strides = [1, 1]} : vector<8x512xf32> to vector<8x128xf32>
    %cst_74 = arith.constant 5.000000e-01 : f32
    %151 = vector.broadcast %cst_74 : f32 to vector<8x128xf32>
    %152 = arith.mulf %151, %150 : vector<8x128xf32>
    %153 = math.tanh %152 : vector<8x128xf32>
    %cst_75 = arith.constant 5.000000e-01 : f32
    %154 = vector.broadcast %cst_75 : f32 to vector<8x128xf32>
    %155 = arith.mulf %154, %153 : vector<8x128xf32>
    %cst_76 = arith.constant 5.000000e-01 : f32
    %156 = vector.broadcast %cst_76 : f32 to vector<8x128xf32>
    %157 = arith.addf %155, %156 : vector<8x128xf32>
    %158 = vector.extract_strided_slice %141 {offsets = [0, 256], sizes = [8, 128], strides = [1, 1]} : vector<8x512xf32> to vector<8x128xf32>
    %159 = math.tanh %158 : vector<8x128xf32>
    %160 = vector.extract_strided_slice %141 {offsets = [0, 384], sizes = [8, 128], strides = [1, 1]} : vector<8x512xf32> to vector<8x128xf32>
    %cst_77 = arith.constant 5.000000e-01 : f32
    %161 = vector.broadcast %cst_77 : f32 to vector<8x128xf32>
    %162 = arith.mulf %161, %160 : vector<8x128xf32>
    %163 = math.tanh %162 : vector<8x128xf32>
    %cst_78 = arith.constant 5.000000e-01 : f32
    %164 = vector.broadcast %cst_78 : f32 to vector<8x128xf32>
    %165 = arith.mulf %164, %163 : vector<8x128xf32>
    %cst_79 = arith.constant 5.000000e-01 : f32
    %166 = vector.broadcast %cst_79 : f32 to vector<8x128xf32>
    %167 = arith.addf %165, %166 : vector<8x128xf32>
    %168 = arith.mulf %157, %128 : vector<8x128xf32>
    %169 = arith.mulf %149, %159 : vector<8x128xf32>
    %170 = arith.addf %168, %169 : vector<8x128xf32>
    %171 = math.tanh %170 : vector<8x128xf32>
    %172 = arith.mulf %167, %171 : vector<8x128xf32>
    %c4_i32 = arith.constant 4 : i32
    %173 = arith.index_cast %c4_i32 : i32 to index
    %c0_80 = arith.constant 0 : index
    %c0_81 = arith.constant 0 : index
    %174 = vector.load %arg2[%173, %c0_80, %c0_81] : memref<8x8x16xf32, #tpu.memory_space<vmem>>, vector<1x8x16xf32>
    %175 = vector.shape_cast %174 : vector<1x8x16xf32> to vector<8x16xf32>
    %c0_82 = arith.constant 0 : index
    %c0_83 = arith.constant 0 : index
    %176 = vector.load %arg3[%c0_82, %c0_83] : memref<16x512xf32, #tpu.memory_space<vmem>>, vector<16x512xf32>
    %cst_84 = arith.constant dense<0.000000e+00> : vector<8x512xf32>
    %177 = tpu.matmul %175, %176, %cst_84 {dimension_numbers = #tpu.dot_dimension_numbers<[1], [0], [0], [1], [0, 0, 1, 1], [], []>} : vector<8x16xf32>, vector<16x512xf32>, vector<8x512xf32> -> vector<8x512xf32>
    %c0_85 = arith.constant 0 : index
    %c0_86 = arith.constant 0 : index
    %178 = vector.load %arg4[%c0_85, %c0_86] : memref<128x512xf32, #tpu.memory_space<vmem>>, vector<128x512xf32>
    %cst_87 = arith.constant dense<0.000000e+00> : vector<8x512xf32>
    %179 = tpu.matmul %172, %178, %cst_87 {dimension_numbers = #tpu.dot_dimension_numbers<[1], [0], [0], [1], [0, 0, 1, 1], [], []>} : vector<8x128xf32>, vector<128x512xf32>, vector<8x512xf32> -> vector<8x512xf32>
    %180 = arith.addf %177, %179 : vector<8x512xf32>
    %c0_88 = arith.constant 0 : index
    %c0_89 = arith.constant 0 : index
    %181 = vector.load %arg5[%c0_88, %c0_89] : memref<1x512xf32, #tpu.memory_space<vmem>>, vector<1x512xf32>
    %182 = vector.broadcast %181 : vector<1x512xf32> to vector<8x512xf32>
    %183 = arith.addf %180, %182 : vector<8x512xf32>
    %184 = vector.extract_strided_slice %183 {offsets = [0, 0], sizes = [8, 128], strides = [1, 1]} : vector<8x512xf32> to vector<8x128xf32>
    %cst_90 = arith.constant 5.000000e-01 : f32
    %185 = vector.broadcast %cst_90 : f32 to vector<8x128xf32>
    %186 = arith.mulf %185, %184 : vector<8x128xf32>
    %187 = math.tanh %186 : vector<8x128xf32>
    %cst_91 = arith.constant 5.000000e-01 : f32
    %188 = vector.broadcast %cst_91 : f32 to vector<8x128xf32>
    %189 = arith.mulf %188, %187 : vector<8x128xf32>
    %cst_92 = arith.constant 5.000000e-01 : f32
    %190 = vector.broadcast %cst_92 : f32 to vector<8x128xf32>
    %191 = arith.addf %189, %190 : vector<8x128xf32>
    %192 = vector.extract_strided_slice %183 {offsets = [0, 128], sizes = [8, 128], strides = [1, 1]} : vector<8x512xf32> to vector<8x128xf32>
    %cst_93 = arith.constant 5.000000e-01 : f32
    %193 = vector.broadcast %cst_93 : f32 to vector<8x128xf32>
    %194 = arith.mulf %193, %192 : vector<8x128xf32>
    %195 = math.tanh %194 : vector<8x128xf32>
    %cst_94 = arith.constant 5.000000e-01 : f32
    %196 = vector.broadcast %cst_94 : f32 to vector<8x128xf32>
    %197 = arith.mulf %196, %195 : vector<8x128xf32>
    %cst_95 = arith.constant 5.000000e-01 : f32
    %198 = vector.broadcast %cst_95 : f32 to vector<8x128xf32>
    %199 = arith.addf %197, %198 : vector<8x128xf32>
    %200 = vector.extract_strided_slice %183 {offsets = [0, 256], sizes = [8, 128], strides = [1, 1]} : vector<8x512xf32> to vector<8x128xf32>
    %201 = math.tanh %200 : vector<8x128xf32>
    %202 = vector.extract_strided_slice %183 {offsets = [0, 384], sizes = [8, 128], strides = [1, 1]} : vector<8x512xf32> to vector<8x128xf32>
    %cst_96 = arith.constant 5.000000e-01 : f32
    %203 = vector.broadcast %cst_96 : f32 to vector<8x128xf32>
    %204 = arith.mulf %203, %202 : vector<8x128xf32>
    %205 = math.tanh %204 : vector<8x128xf32>
    %cst_97 = arith.constant 5.000000e-01 : f32
    %206 = vector.broadcast %cst_97 : f32 to vector<8x128xf32>
    %207 = arith.mulf %206, %205 : vector<8x128xf32>
    %cst_98 = arith.constant 5.000000e-01 : f32
    %208 = vector.broadcast %cst_98 : f32 to vector<8x128xf32>
    %209 = arith.addf %207, %208 : vector<8x128xf32>
    %210 = arith.mulf %199, %170 : vector<8x128xf32>
    %211 = arith.mulf %191, %201 : vector<8x128xf32>
    %212 = arith.addf %210, %211 : vector<8x128xf32>
    %213 = math.tanh %212 : vector<8x128xf32>
    %214 = arith.mulf %209, %213 : vector<8x128xf32>
    %c5_i32 = arith.constant 5 : i32
    %215 = arith.index_cast %c5_i32 : i32 to index
    %c0_99 = arith.constant 0 : index
    %c0_100 = arith.constant 0 : index
    %216 = vector.load %arg2[%215, %c0_99, %c0_100] : memref<8x8x16xf32, #tpu.memory_space<vmem>>, vector<1x8x16xf32>
    %217 = vector.shape_cast %216 : vector<1x8x16xf32> to vector<8x16xf32>
    %c0_101 = arith.constant 0 : index
    %c0_102 = arith.constant 0 : index
    %218 = vector.load %arg3[%c0_101, %c0_102] : memref<16x512xf32, #tpu.memory_space<vmem>>, vector<16x512xf32>
    %cst_103 = arith.constant dense<0.000000e+00> : vector<8x512xf32>
    %219 = tpu.matmul %217, %218, %cst_103 {dimension_numbers = #tpu.dot_dimension_numbers<[1], [0], [0], [1], [0, 0, 1, 1], [], []>} : vector<8x16xf32>, vector<16x512xf32>, vector<8x512xf32> -> vector<8x512xf32>
    %c0_104 = arith.constant 0 : index
    %c0_105 = arith.constant 0 : index
    %220 = vector.load %arg4[%c0_104, %c0_105] : memref<128x512xf32, #tpu.memory_space<vmem>>, vector<128x512xf32>
    %cst_106 = arith.constant dense<0.000000e+00> : vector<8x512xf32>
    %221 = tpu.matmul %214, %220, %cst_106 {dimension_numbers = #tpu.dot_dimension_numbers<[1], [0], [0], [1], [0, 0, 1, 1], [], []>} : vector<8x128xf32>, vector<128x512xf32>, vector<8x512xf32> -> vector<8x512xf32>
    %222 = arith.addf %219, %221 : vector<8x512xf32>
    %c0_107 = arith.constant 0 : index
    %c0_108 = arith.constant 0 : index
    %223 = vector.load %arg5[%c0_107, %c0_108] : memref<1x512xf32, #tpu.memory_space<vmem>>, vector<1x512xf32>
    %224 = vector.broadcast %223 : vector<1x512xf32> to vector<8x512xf32>
    %225 = arith.addf %222, %224 : vector<8x512xf32>
    %226 = vector.extract_strided_slice %225 {offsets = [0, 0], sizes = [8, 128], strides = [1, 1]} : vector<8x512xf32> to vector<8x128xf32>
    %cst_109 = arith.constant 5.000000e-01 : f32
    %227 = vector.broadcast %cst_109 : f32 to vector<8x128xf32>
    %228 = arith.mulf %227, %226 : vector<8x128xf32>
    %229 = math.tanh %228 : vector<8x128xf32>
    %cst_110 = arith.constant 5.000000e-01 : f32
    %230 = vector.broadcast %cst_110 : f32 to vector<8x128xf32>
    %231 = arith.mulf %230, %229 : vector<8x128xf32>
    %cst_111 = arith.constant 5.000000e-01 : f32
    %232 = vector.broadcast %cst_111 : f32 to vector<8x128xf32>
    %233 = arith.addf %231, %232 : vector<8x128xf32>
    %234 = vector.extract_strided_slice %225 {offsets = [0, 128], sizes = [8, 128], strides = [1, 1]} : vector<8x512xf32> to vector<8x128xf32>
    %cst_112 = arith.constant 5.000000e-01 : f32
    %235 = vector.broadcast %cst_112 : f32 to vector<8x128xf32>
    %236 = arith.mulf %235, %234 : vector<8x128xf32>
    %237 = math.tanh %236 : vector<8x128xf32>
    %cst_113 = arith.constant 5.000000e-01 : f32
    %238 = vector.broadcast %cst_113 : f32 to vector<8x128xf32>
    %239 = arith.mulf %238, %237 : vector<8x128xf32>
    %cst_114 = arith.constant 5.000000e-01 : f32
    %240 = vector.broadcast %cst_114 : f32 to vector<8x128xf32>
    %241 = arith.addf %239, %240 : vector<8x128xf32>
    %242 = vector.extract_strided_slice %225 {offsets = [0, 256], sizes = [8, 128], strides = [1, 1]} : vector<8x512xf32> to vector<8x128xf32>
    %243 = math.tanh %242 : vector<8x128xf32>
    %244 = vector.extract_strided_slice %225 {offsets = [0, 384], sizes = [8, 128], strides = [1, 1]} : vector<8x512xf32> to vector<8x128xf32>
    %cst_115 = arith.constant 5.000000e-01 : f32
    %245 = vector.broadcast %cst_115 : f32 to vector<8x128xf32>
    %246 = arith.mulf %245, %244 : vector<8x128xf32>
    %247 = math.tanh %246 : vector<8x128xf32>
    %cst_116 = arith.constant 5.000000e-01 : f32
    %248 = vector.broadcast %cst_116 : f32 to vector<8x128xf32>
    %249 = arith.mulf %248, %247 : vector<8x128xf32>
    %cst_117 = arith.constant 5.000000e-01 : f32
    %250 = vector.broadcast %cst_117 : f32 to vector<8x128xf32>
    %251 = arith.addf %249, %250 : vector<8x128xf32>
    %252 = arith.mulf %241, %212 : vector<8x128xf32>
    %253 = arith.mulf %233, %243 : vector<8x128xf32>
    %254 = arith.addf %252, %253 : vector<8x128xf32>
    %255 = math.tanh %254 : vector<8x128xf32>
    %256 = arith.mulf %251, %255 : vector<8x128xf32>
    %c6_i32 = arith.constant 6 : i32
    %257 = arith.index_cast %c6_i32 : i32 to index
    %c0_118 = arith.constant 0 : index
    %c0_119 = arith.constant 0 : index
    %258 = vector.load %arg2[%257, %c0_118, %c0_119] : memref<8x8x16xf32, #tpu.memory_space<vmem>>, vector<1x8x16xf32>
    %259 = vector.shape_cast %258 : vector<1x8x16xf32> to vector<8x16xf32>
    %c0_120 = arith.constant 0 : index
    %c0_121 = arith.constant 0 : index
    %260 = vector.load %arg3[%c0_120, %c0_121] : memref<16x512xf32, #tpu.memory_space<vmem>>, vector<16x512xf32>
    %cst_122 = arith.constant dense<0.000000e+00> : vector<8x512xf32>
    %261 = tpu.matmul %259, %260, %cst_122 {dimension_numbers = #tpu.dot_dimension_numbers<[1], [0], [0], [1], [0, 0, 1, 1], [], []>} : vector<8x16xf32>, vector<16x512xf32>, vector<8x512xf32> -> vector<8x512xf32>
    %c0_123 = arith.constant 0 : index
    %c0_124 = arith.constant 0 : index
    %262 = vector.load %arg4[%c0_123, %c0_124] : memref<128x512xf32, #tpu.memory_space<vmem>>, vector<128x512xf32>
    %cst_125 = arith.constant dense<0.000000e+00> : vector<8x512xf32>
    %263 = tpu.matmul %256, %262, %cst_125 {dimension_numbers = #tpu.dot_dimension_numbers<[1], [0], [0], [1], [0, 0, 1, 1], [], []>} : vector<8x128xf32>, vector<128x512xf32>, vector<8x512xf32> -> vector<8x512xf32>
    %264 = arith.addf %261, %263 : vector<8x512xf32>
    %c0_126 = arith.constant 0 : index
    %c0_127 = arith.constant 0 : index
    %265 = vector.load %arg5[%c0_126, %c0_127] : memref<1x512xf32, #tpu.memory_space<vmem>>, vector<1x512xf32>
    %266 = vector.broadcast %265 : vector<1x512xf32> to vector<8x512xf32>
    %267 = arith.addf %264, %266 : vector<8x512xf32>
    %268 = vector.extract_strided_slice %267 {offsets = [0, 0], sizes = [8, 128], strides = [1, 1]} : vector<8x512xf32> to vector<8x128xf32>
    %cst_128 = arith.constant 5.000000e-01 : f32
    %269 = vector.broadcast %cst_128 : f32 to vector<8x128xf32>
    %270 = arith.mulf %269, %268 : vector<8x128xf32>
    %271 = math.tanh %270 : vector<8x128xf32>
    %cst_129 = arith.constant 5.000000e-01 : f32
    %272 = vector.broadcast %cst_129 : f32 to vector<8x128xf32>
    %273 = arith.mulf %272, %271 : vector<8x128xf32>
    %cst_130 = arith.constant 5.000000e-01 : f32
    %274 = vector.broadcast %cst_130 : f32 to vector<8x128xf32>
    %275 = arith.addf %273, %274 : vector<8x128xf32>
    %276 = vector.extract_strided_slice %267 {offsets = [0, 128], sizes = [8, 128], strides = [1, 1]} : vector<8x512xf32> to vector<8x128xf32>
    %cst_131 = arith.constant 5.000000e-01 : f32
    %277 = vector.broadcast %cst_131 : f32 to vector<8x128xf32>
    %278 = arith.mulf %277, %276 : vector<8x128xf32>
    %279 = math.tanh %278 : vector<8x128xf32>
    %cst_132 = arith.constant 5.000000e-01 : f32
    %280 = vector.broadcast %cst_132 : f32 to vector<8x128xf32>
    %281 = arith.mulf %280, %279 : vector<8x128xf32>
    %cst_133 = arith.constant 5.000000e-01 : f32
    %282 = vector.broadcast %cst_133 : f32 to vector<8x128xf32>
    %283 = arith.addf %281, %282 : vector<8x128xf32>
    %284 = vector.extract_strided_slice %267 {offsets = [0, 256], sizes = [8, 128], strides = [1, 1]} : vector<8x512xf32> to vector<8x128xf32>
    %285 = math.tanh %284 : vector<8x128xf32>
    %286 = vector.extract_strided_slice %267 {offsets = [0, 384], sizes = [8, 128], strides = [1, 1]} : vector<8x512xf32> to vector<8x128xf32>
    %cst_134 = arith.constant 5.000000e-01 : f32
    %287 = vector.broadcast %cst_134 : f32 to vector<8x128xf32>
    %288 = arith.mulf %287, %286 : vector<8x128xf32>
    %289 = math.tanh %288 : vector<8x128xf32>
    %cst_135 = arith.constant 5.000000e-01 : f32
    %290 = vector.broadcast %cst_135 : f32 to vector<8x128xf32>
    %291 = arith.mulf %290, %289 : vector<8x128xf32>
    %cst_136 = arith.constant 5.000000e-01 : f32
    %292 = vector.broadcast %cst_136 : f32 to vector<8x128xf32>
    %293 = arith.addf %291, %292 : vector<8x128xf32>
    %294 = arith.mulf %283, %254 : vector<8x128xf32>
    %295 = arith.mulf %275, %285 : vector<8x128xf32>
    %296 = arith.addf %294, %295 : vector<8x128xf32>
    %297 = math.tanh %296 : vector<8x128xf32>
    %298 = arith.mulf %293, %297 : vector<8x128xf32>
    %c7_i32 = arith.constant 7 : i32
    %299 = arith.index_cast %c7_i32 : i32 to index
    %c0_137 = arith.constant 0 : index
    %c0_138 = arith.constant 0 : index
    %300 = vector.load %arg2[%299, %c0_137, %c0_138] : memref<8x8x16xf32, #tpu.memory_space<vmem>>, vector<1x8x16xf32>
    %301 = vector.shape_cast %300 : vector<1x8x16xf32> to vector<8x16xf32>
    %c0_139 = arith.constant 0 : index
    %c0_140 = arith.constant 0 : index
    %302 = vector.load %arg3[%c0_139, %c0_140] : memref<16x512xf32, #tpu.memory_space<vmem>>, vector<16x512xf32>
    %cst_141 = arith.constant dense<0.000000e+00> : vector<8x512xf32>
    %303 = tpu.matmul %301, %302, %cst_141 {dimension_numbers = #tpu.dot_dimension_numbers<[1], [0], [0], [1], [0, 0, 1, 1], [], []>} : vector<8x16xf32>, vector<16x512xf32>, vector<8x512xf32> -> vector<8x512xf32>
    %c0_142 = arith.constant 0 : index
    %c0_143 = arith.constant 0 : index
    %304 = vector.load %arg4[%c0_142, %c0_143] : memref<128x512xf32, #tpu.memory_space<vmem>>, vector<128x512xf32>
    %cst_144 = arith.constant dense<0.000000e+00> : vector<8x512xf32>
    %305 = tpu.matmul %298, %304, %cst_144 {dimension_numbers = #tpu.dot_dimension_numbers<[1], [0], [0], [1], [0, 0, 1, 1], [], []>} : vector<8x128xf32>, vector<128x512xf32>, vector<8x512xf32> -> vector<8x512xf32>
    %306 = arith.addf %303, %305 : vector<8x512xf32>
    %c0_145 = arith.constant 0 : index
    %c0_146 = arith.constant 0 : index
    %307 = vector.load %arg5[%c0_145, %c0_146] : memref<1x512xf32, #tpu.memory_space<vmem>>, vector<1x512xf32>
    %308 = vector.broadcast %307 : vector<1x512xf32> to vector<8x512xf32>
    %309 = arith.addf %306, %308 : vector<8x512xf32>
    %310 = vector.extract_strided_slice %309 {offsets = [0, 0], sizes = [8, 128], strides = [1, 1]} : vector<8x512xf32> to vector<8x128xf32>
    %cst_147 = arith.constant 5.000000e-01 : f32
    %311 = vector.broadcast %cst_147 : f32 to vector<8x128xf32>
    %312 = arith.mulf %311, %310 : vector<8x128xf32>
    %313 = math.tanh %312 : vector<8x128xf32>
    %cst_148 = arith.constant 5.000000e-01 : f32
    %314 = vector.broadcast %cst_148 : f32 to vector<8x128xf32>
    %315 = arith.mulf %314, %313 : vector<8x128xf32>
    %cst_149 = arith.constant 5.000000e-01 : f32
    %316 = vector.broadcast %cst_149 : f32 to vector<8x128xf32>
    %317 = arith.addf %315, %316 : vector<8x128xf32>
    %318 = vector.extract_strided_slice %309 {offsets = [0, 128], sizes = [8, 128], strides = [1, 1]} : vector<8x512xf32> to vector<8x128xf32>
    %cst_150 = arith.constant 5.000000e-01 : f32
    %319 = vector.broadcast %cst_150 : f32 to vector<8x128xf32>
    %320 = arith.mulf %319, %318 : vector<8x128xf32>
    %321 = math.tanh %320 : vector<8x128xf32>
    %cst_151 = arith.constant 5.000000e-01 : f32
    %322 = vector.broadcast %cst_151 : f32 to vector<8x128xf32>
    %323 = arith.mulf %322, %321 : vector<8x128xf32>
    %cst_152 = arith.constant 5.000000e-01 : f32
    %324 = vector.broadcast %cst_152 : f32 to vector<8x128xf32>
    %325 = arith.addf %323, %324 : vector<8x128xf32>
    %326 = vector.extract_strided_slice %309 {offsets = [0, 256], sizes = [8, 128], strides = [1, 1]} : vector<8x512xf32> to vector<8x128xf32>
    %327 = math.tanh %326 : vector<8x128xf32>
    %328 = vector.extract_strided_slice %309 {offsets = [0, 384], sizes = [8, 128], strides = [1, 1]} : vector<8x512xf32> to vector<8x128xf32>
    %cst_153 = arith.constant 5.000000e-01 : f32
    %329 = vector.broadcast %cst_153 : f32 to vector<8x128xf32>
    %330 = arith.mulf %329, %328 : vector<8x128xf32>
    %331 = math.tanh %330 : vector<8x128xf32>
    %cst_154 = arith.constant 5.000000e-01 : f32
    %332 = vector.broadcast %cst_154 : f32 to vector<8x128xf32>
    %333 = arith.mulf %332, %331 : vector<8x128xf32>
    %cst_155 = arith.constant 5.000000e-01 : f32
    %334 = vector.broadcast %cst_155 : f32 to vector<8x128xf32>
    %335 = arith.addf %333, %334 : vector<8x128xf32>
    %336 = arith.mulf %325, %296 : vector<8x128xf32>
    %337 = arith.mulf %317, %327 : vector<8x128xf32>
    %338 = arith.addf %336, %337 : vector<8x128xf32>
    %339 = math.tanh %338 : vector<8x128xf32>
    %340 = arith.mulf %335, %339 : vector<8x128xf32>
    %c8_i32 = arith.constant 8 : i32
    %c0_156 = arith.constant 0 : index
    %c0_157 = arith.constant 0 : index
    %341 = vector.load %arg9[%c0_156, %c0_157] : memref<8x128xf32, #tpu.memory_space<vmem>>, vector<8x128xf32>
    tpu.vector_store %arg9[%c0_156, %c0_157], %340 {strides = array<i32>} : memref<8x128xf32, #tpu.memory_space<vmem>>, vector<8x128xf32>,
    %c0_158 = arith.constant 0 : index
    %c0_159 = arith.constant 0 : index
    %342 = vector.load %arg10[%c0_158, %c0_159] : memref<8x128xf32, #tpu.memory_space<vmem>>, vector<8x128xf32>
    tpu.vector_store %arg10[%c0_158, %c0_159], %338 {strides = array<i32>} : memref<8x128xf32, #tpu.memory_space<vmem>>, vector<8x128xf32>,
    %c0_i32_160 = arith.constant 0 : i32
    %343 = arith.cmpi eq, %arg1, %c0_i32_160 : i32
    %344 = arith.extui %343 : i1 to i32
    %c0_i32_161 = arith.constant 0 : i32
    %345 = arith.cmpi ne, %344, %c0_i32_161 : i32
    scf.if %345 {
      %c0_162 = arith.constant 0 : index
      %c0_163 = arith.constant 0 : index
      %346 = vector.load %arg6[%c0_162, %c0_163] : memref<128x128xf32, #tpu.memory_space<vmem>>, vector<128x128xf32>
      %cst_164 = arith.constant dense<0.000000e+00> : vector<8x128xf32>
      %347 = tpu.matmul %340, %346, %cst_164 {dimension_numbers = #tpu.dot_dimension_numbers<[1], [0], [0], [1], [0, 0, 1, 1], [], []>} : vector<8x128xf32>, vector<128x128xf32>, vector<8x128xf32> -> vector<8x128xf32>
      %c0_165 = arith.constant 0 : index
      %c0_166 = arith.constant 0 : index
      %348 = vector.load %arg7[%c0_165, %c0_166] : memref<1x128xf32, #tpu.memory_space<vmem>>, vector<1x128xf32>
      %349 = vector.broadcast %348 : vector<1x128xf32> to vector<8x128xf32>
      %350 = arith.addf %347, %349 : vector<8x128xf32>
      %351 = tpu.iota {dimensions = array<i32: 1>} : vector<8x128xi32>
      %c16_i32 = arith.constant 16 : i32
      %352 = vector.broadcast %c16_i32 : i32 to vector<8x128xi32>
      %353 = arith.cmpi slt, %351, %352 : vector<8x128xi32>
      %cst_167 = arith.constant -1.000000e+30 : f32
      %354 = vector.broadcast %cst_167 : f32 to vector<8x128xf32>
      %355 = arith.select %353, %350, %354 : vector<8x128xi1>, vector<8x128xf32>
      %cst_168 = arith.constant dense<0xFF800000> : vector<8xf32>
      %356 = vector.multi_reduction <maximumf>, %355, %cst_168 [1] : vector<8x128xf32> to vector<8xf32>
      %357 = vector.shape_cast %356 : vector<8xf32> to vector<8x1xf32>
      %358 = vector.broadcast %357 : vector<8x1xf32> to vector<8x128xf32>
      %359 = arith.subf %355, %358 : vector<8x128xf32>
      %360 = math.exp %359 : vector<8x128xf32>
      %cst_169 = arith.constant dense<0.000000e+00> : vector<8xf32>
      %361 = vector.multi_reduction <add>, %360, %cst_169 [1] : vector<8x128xf32> to vector<8xf32>
      %362 = vector.shape_cast %361 : vector<8xf32> to vector<8x1xf32>
      %363 = vector.broadcast %362 : vector<8x1xf32> to vector<8x128xf32>
      %364 = arith.divf %360, %363 : vector<8x128xf32>
      %365 = math.tanh %350 : vector<8x128xf32>
      %c16_i32_170 = arith.constant 16 : i32
      %366 = vector.broadcast %c16_i32_170 : i32 to vector<8x128xi32>
      %367 = arith.cmpi eq, %351, %366 : vector<8x128xi32>
      %cst_171 = arith.constant 0.000000e+00 : f32
      %368 = vector.broadcast %cst_171 : f32 to vector<8x128xf32>
      %369 = arith.select %367, %365, %368 : vector<8x128xi1>, vector<8x128xf32>
      %370 = arith.select %353, %364, %369 : vector<8x128xi1>, vector<8x128xf32>
      %c0_172 = arith.constant 0 : index
      %c0_173 = arith.constant 0 : index
      %371 = vector.load %arg8[%c0_172, %c0_173] : memref<8x128xf32, #tpu.memory_space<vmem>>, vector<8x128xf32>
      tpu.vector_store %arg8[%c0_172, %c0_173], %370 {strides = array<i32>} : memref<8x128xf32, #tpu.memory_space<vmem>>, vector<8x128xf32>,
    } else {
    }
    return
  }
  func.func @transform_0(%arg0: i32, %arg1: i32) -> (i32, i32, i32) {
    %c0_i32 = arith.constant 0 : i32
    %c0_i32_0 = arith.constant 0 : i32
    return %arg1, %arg0, %c0_i32 : i32, i32, i32
  }
  func.func @transform_1(%arg0: i32, %arg1: i32) -> (i32, i32) {
    %c0_i32 = arith.constant 0 : i32
    %c0_i32_0 = arith.constant 0 : i32
    %c0_i32_1 = arith.constant 0 : i32
    return %c0_i32, %c0_i32_0 : i32, i32
  }
  func.func @transform_2(%arg0: i32, %arg1: i32) -> (i32, i32) {
    %c0_i32 = arith.constant 0 : i32
    %c0_i32_0 = arith.constant 0 : i32
    %c0_i32_1 = arith.constant 0 : i32
    return %c0_i32, %c0_i32_0 : i32, i32
  }
  func.func @transform_3(%arg0: i32, %arg1: i32) -> (i32, i32) {
    %c0_i32 = arith.constant 0 : i32
    %c0_i32_0 = arith.constant 0 : i32
    %c0_i32_1 = arith.constant 0 : i32
    return %c0_i32, %c0_i32_0 : i32, i32
  }
  func.func @transform_4(%arg0: i32, %arg1: i32) -> (i32, i32) {
    %c0_i32 = arith.constant 0 : i32
    %c0_i32_0 = arith.constant 0 : i32
    %c0_i32_1 = arith.constant 0 : i32
    return %c0_i32, %c0_i32_0 : i32, i32
  }
  func.func @transform_5(%arg0: i32, %arg1: i32) -> (i32, i32) {
    %c0_i32 = arith.constant 0 : i32
    %c0_i32_0 = arith.constant 0 : i32
    %c0_i32_1 = arith.constant 0 : i32
    return %c0_i32, %c0_i32_0 : i32, i32
  }
  func.func @transform_6(%arg0: i32, %arg1: i32) -> (i32, i32) {
    %c0_i32 = arith.constant 0 : i32
    %c0_i32_0 = arith.constant 0 : i32
    return %arg0, %c0_i32 : i32, i32
  }
}

</mosaic_0001>

<bundles_post_ra>
// kernel: nim_forward.1
= control target key start
LH: loop header
LB: loop body
LE: loop exit
PB: predicated region body
PF: predicated region fallthrough
CT: control target
= control target key end

     0   :  { %11 = vsyncpa [#allocation5], 0  ;;  %s4242_s0 = inlined_call_operand.vmem [shape: f32[8,8,16], index: 0, kind: input, shape index: {}]   ;;  %s4243_s1 = inlined_call_operand.hbm [shape: f32[16,512], index: 1, kind: input, shape index: {}]   ;;  %s4244_s2 = inlined_call_operand.hbm [shape: f32[128,512], index: 2, kind: input, shape index: {}]   ;;  %s4245_s3 = inlined_call_operand.vmem [shape: f32[1,512], index: 3, kind: input, shape index: {}]   ;;  %s4246_s4 = inlined_call_operand.vmem [shape: f32[128,128], index: 4, kind: input, shape index: {}]   ;;  %s4247_s5 = inlined_call_operand.vmem [shape: f32[1,128], index: 5, kind: input, shape index: {}]   ;;  %s4248_s6 = inlined_call_operand.vmem [shape: f32[8,128], index: 6, kind: output, shape index: {}]  }
   0x1   :  { %12 = vsyncpa [#allocation7], 0  ;;  %s3612_s21 = smov [#allocation4]   ;;  %s3564_s25 = scalar_lea.hbm %s4243_s1, 1024 }
   0x2   :  { %s20_s22 = sshll.u32 %s3612_s21, 4  ;;  %p3565_p0 = scmp.ne.s32.totalorder %s4243_s1, %s3564_s25  ;;  %s21_s22 = int_to_ptr.vmem [resolvable:$true] %s20_s22 }
   0x3   :  { %p3568_p1 = scmp.lt.u32.totalorder %s3564_s25, %s4243_s1 }
   0x5   :  { %p3570_p2 = pnand %p3568_p1, %p3565_p0 }
   0x7   :  { %3573 = shalt.err (!%p3570_p2)
}
   0x8   :  { %s3574_s30 = scalar_lea.vmem %s21_s22, 1024  ;;  %p3579_p4 = scmp.lt.s32.totalorder %s21_s22, %s21_s22 }
   0x9   :  { %p3575_p3 = scmp.ne.s32.totalorder %s21_s22, %s3574_s30  ;;  %p3580_p5 = scmp.lt.s32.totalorder %s3574_s30, %s3574_s30 }
   0xb   :  { %p3581_p6 = por %p3580_p5, %p3579_p4 }
   0xd   :  { %p3582_p7 = pnand %p3581_p6, %p3575_p3 }
   0xf   :  { %3585 = shalt.err (!%p3582_p7)
}
  0x10   :  { %s3613_s7 = smov 512   ;;  %s3614_s8 = smov 32  }
  0x11   :  { %26 = dma.hbm_to_vmem [thread:$0]  %s4243_s1, 1024, %s21_s22, [#allocation5], %s3613_s7, %s3613_s7, %s3614_s8  }
  0x12   :  { %s3615_s11 = smov [#allocation6]   ;;  %s3586_s15 = scalar_lea.hbm %s4244_s2, 8192 }
  0x13   :  { %s32_s12 = sshll.u32 %s3615_s11, 4  ;;  %p3587_p8 = scmp.ne.s32.totalorder %s4244_s2, %s3586_s15  ;;  %s33_s12 = int_to_ptr.vmem [resolvable:$true] %s32_s12 }
  0x14   :  { %p3590_p9 = scmp.lt.u32.totalorder %s3586_s15, %s4244_s2 }
  0x16   :  { %p3592_p10 = pnand %p3590_p9, %p3587_p8 }
  0x18   :  { %3595 = shalt.err (!%p3592_p10)
}
  0x19   :  { %s3596_s20 = scalar_lea.vmem %s33_s12, 8192  ;;  %p3601_p12 = scmp.lt.s32.totalorder %s33_s12, %s33_s12 }
  0x1a   :  { %p3597_p11 = scmp.ne.s32.totalorder %s33_s12, %s3596_s20  ;;  %p3602_p13 = scmp.lt.s32.totalorder %s3596_s20, %s3596_s20 }
  0x1c   :  { %p3603_p0 = por %p3602_p13, %p3601_p12 }
  0x1e   :  { %p3604_p1 = pnand %p3603_p0, %p3597_p11 }
  0x20   :  { %3607 = shalt.err (!%p3604_p1)
}
  0x21   :  { %38 = dma.hbm_to_vmem [thread:$0]  %s4244_s2, 8192, %s33_s12, [#allocation7], %s3613_s7, %s3613_s7, %s3614_s8  }
  0x22   :  { %3608 = dma.done.wait [#allocation5], 1024  }
  0x23   :  { %3609 = vsyncadd [#allocation5], 4294966272 }
  0x24   :  { %3610 = dma.done.wait [#allocation7], 8192  }
  0x25   :  { %3611 = vsyncadd [#allocation7], 4294959104  ;;  %v3616_v0 = vmov 0.0   ;;  %v71_v1 = vld [vmem:[#allocation6 + $0x18] sm:$0xff]  ;;  %v70_v3 = vld [vmem:[#allocation6 + $0x10] sm:$0xff]  ;;  %vm274_vm0 = vcmask 130048  }
  0x26   :  { %267 = vmatprep.mubr.f32.mxu1 %v3616_v0  ;;  %196 = vmatprep.mubr.f32.mxu0 %v3616_v0  ;;  %v75_v2 = vld [vmem:[#allocation6 + $0x38] sm:$0xff]  ;;  %v74_v5 = vld [vmem:[#allocation6 + $0x30] sm:$0xff]  ;;  %v69_v6 = vld [vmem:[#allocation6 + $0x8] sm:$0xff]  ;;  %vm3618_vm1 = vmmov 0  }
  0x27   :  { %v3680_v4 = vpack.c.bf16 %v75_v2, %v71_v1  ;;  %v73_v7 = vld [vmem:[#allocation6 + $0x28] sm:$0xff]  ;;  %v3682_v8 = vpack.c.bf16 %v74_v5, %v70_v3  ;;  %v79_v10 = vld [vmem:[#allocation6 + $0x58] sm:$0xff]  ;;  %v68_v12 = vld [vmem:[#allocation6] sm:$0xff] }
  0x28   :  { %v3684_v9 = vpack.c.bf16 %v73_v7, %v69_v6  ;;  %v83_v11 = vld [vmem:[#allocation6 + $0x78] sm:$0xff]  ;;  %v72_v14 = vld [vmem:[#allocation6 + $0x20] sm:$0xff]  ;;  %v78_v15 = vld [vmem:[#allocation6 + $0x50] sm:$0xff] }
  0x29   :  { %2872 = vmatprep.subr.bf16.mxu1 %v3680_v4  ;;  %v3687_v13 = vpack.c.bf16 %v83_v11, %v79_v10  ;;  %v82_v16 = vld [vmem:[#allocation6 + $0x70] sm:$0xff]  ;;  %v3691_v17 = vpack.c.bf16 %v72_v14, %v68_v12  ;;  %v77_v19 = vld [vmem:[#allocation6 + $0x48] sm:$0xff]  ;;  %v87_v21 = vld [vmem:[#allocation6 + $0x98] sm:$0xff] }
  0x2a   :  { %2874 = vmatpush1.bf16.msra.mxu1 %v3682_v8  ;;  %2840 = vmatprep.subr.bf16.mxu0 %v3684_v9  ;;  %v3693_v18 = vpack.c.bf16 %v82_v16, %v78_v15  ;;  %v81_v20 = vld [vmem:[#allocation6 + $0x68] sm:$0xff]  ;;  %v91_v23 = vld [vmem:[#allocation6 + $0xb8] sm:$0xff]  ;;  %v76_v24 = vld [vmem:[#allocation6 + $0x40] sm:$0xff] }
  0x2b   :  { %2876 = vmatprep.subr.bf16.mxu1 %v3687_v13  ;;  %v3696_v22 = vpack.c.bf16 %v81_v20, %v77_v19  ;;  %v80_v25 = vld [vmem:[#allocation6 + $0x60] sm:$0xff]  ;;  %2842 = vmatpush1.bf16.msra.mxu0 %v3691_v17  ;;  %v3699_v26 = vpack.c.bf16 %v91_v23, %v87_v21  ;;  %v86_v28 = vld [vmem:[#allocation6 + $0x90] sm:$0xff]  ;;  %v85_v30 = vld [vmem:[#allocation6 + $0x88] sm:$0xff] }
  0x2c   :  { %v3701_v27 = vpack.c.bf16 %v80_v25, %v76_v24  ;;  %v90_v29 = vld [vmem:[#allocation6 + $0xb0] sm:$0xff]  ;;  %v89_v31 = vld [vmem:[#allocation6 + $0xa8] sm:$0xff]  ;;  %v95_v32 = vld [vmem:[#allocation6 + $0xd8] sm:$0xff] }
  0x2d   :  { %2844 = vmatprep.subr.bf16.mxu0 %v3696_v22  ;;  %v99_v33 = vld [vmem:[#allocation6 + $0xf8] sm:$0xff]  ;;  %v3705_v34 = vpack.c.bf16 %v90_v29, %v86_v28  ;;  %v3707_v35 = vpack.c.bf16 %v89_v31, %v85_v30  ;;  %v84_v36 = vld [vmem:[#allocation6 + $0x80] sm:$0xff]  ;;  %v94_v38 = vld [vmem:[#allocation6 + $0xd0] sm:$0xff] }
  0x2e   :  { %2878 = vmatpush1.bf16.msra.mxu1 %v3693_v18  ;;  %v88_v37 = vld [vmem:[#allocation6 + $0xa0] sm:$0xff]  ;;  %v3710_v39 = vpack.c.bf16 %v99_v33, %v95_v32  ;;  %v98_v40 = vld [vmem:[#allocation6 + $0xf0] sm:$0xff]  ;;  %v93_v41 = vld [vmem:[#allocation6 + $0xc8] sm:$0xff] }
  0x2f   :  { %2880 = vmatprep.subr.bf16.mxu1 %v3699_v26  ;;  %v97_v42 = vld [vmem:[#allocation6 + $0xe8] sm:$0xff]  ;;  %2846 = vmatpush1.bf16.msra.mxu0 %v3701_v27  ;;  %v3713_v43 = vpack.c.bf16 %v88_v37, %v84_v36  ;;  %v103_v44 = vld [vmem:[#allocation6 + $0x118] sm:$0xff]  ;;  %v92_v47 = vld [vmem:[#allocation6 + $0xc0] sm:$0xff]  ;;  %v3719_v49 = vpack.c.bf16 %v98_v40, %v94_v38 }
  0x30   :  { %v107_v45 = vld [vmem:[#allocation6 + $0x138] sm:$0xff]  ;;  %2848 = vmatprep.subr.bf16.mxu0 %v3707_v35  ;;  %v3716_v46 = vpack.c.bf16 %v97_v42, %v93_v41  ;;  %v96_v48 = vld [vmem:[#allocation6 + $0xe0] sm:$0xff]  ;;  %v101_v50 = vld [vmem:[#allocation6 + $0x108] sm:$0xff] }
  0x31   :  { %v105_v51 = vld [vmem:[#allocation6 + $0x128] sm:$0xff]  ;;  %v3722_v52 = vpack.c.bf16 %v107_v45, %v103_v44  ;;  %v102_v53 = vld [vmem:[#allocation6 + $0x110] sm:$0xff]  ;;  %v3725_v55 = vpack.c.bf16 %v96_v48, %v92_v47  ;;  %v111_v56 = vld [vmem:[#allocation6 + $0x158] sm:$0xff] }
  0x32   :  { %2882 = vmatpush1.bf16.msra.mxu1 %v3705_v34  ;;  %v106_v54 = vld [vmem:[#allocation6 + $0x130] sm:$0xff]  ;;  %v115_v57 = vld [vmem:[#allocation6 + $0x178] sm:$0xff]  ;;  %v3728_v58 = vpack.c.bf16 %v105_v51, %v101_v50  ;;  %v100_v59 = vld [vmem:[#allocation6 + $0x100] sm:$0xff] }
  0x33   :  { %2884 = vmatprep.subr.bf16.mxu1 %v3710_v39  ;;  %2850 = vmatpush1.bf16.msra.mxu0 %v3713_v43  ;;  %v104_v60 = vld [vmem:[#allocation6 + $0x120] sm:$0xff]  ;;  %v3731_v61 = vpack.c.bf16 %v106_v54, %v102_v53  ;;  %v109_v62 = vld [vmem:[#allocation6 + $0x148] sm:$0xff]  ;;  %v3734_v1 = vpack.c.bf16 %v115_v57, %v111_v56  ;;  %v110_v2 = vld [vmem:[#allocation6 + $0x150] sm:$0xff] }
  0x34   :  { %2852 = vmatprep.subr.bf16.mxu0 %v3716_v46  ;;  %v113_v63 = vld [vmem:[#allocation6 + $0x168] sm:$0xff]  ;;  %v114_v3 = vld [vmem:[#allocation6 + $0x170] sm:$0xff]  ;;  %v3737_v5 = vpack.c.bf16 %v104_v60, %v100_v59  ;;  %v119_v6 = vld [vmem:[#allocation6 + $0x198] sm:$0xff] }
  0x35   :  { %v123_v7 = vld [vmem:[#allocation6 + $0x1b8] sm:$0xff]  ;;  %v3740_v10 = vpack.c.bf16 %v113_v63, %v109_v62  ;;  %v108_v11 = vld [vmem:[#allocation6 + $0x140] sm:$0xff]  ;;  %v3743_v14 = vpack.c.bf16 %v114_v3, %v110_v2  ;;  %v117_v15 = vld [vmem:[#allocation6 + $0x188] sm:$0xff] }
  0x36   :  { %2886 = vmatpush1.bf16.msra.mxu1 %v3719_v49  ;;  %v112_v12 = vld [vmem:[#allocation6 + $0x160] sm:$0xff]  ;;  %v121_v16 = vld [vmem:[#allocation6 + $0x1a8] sm:$0xff]  ;;  %v3746_v19 = vpack.c.bf16 %v123_v7, %v119_v6  ;;  %v118_v20 = vld [vmem:[#allocation6 + $0x190] sm:$0xff]  ;;  %v422_v6 = vlaneseq }
  0x37   :  { %2888 = vmatprep.subr.bf16.mxu1 %v3722_v52  ;;  %2854 = vmatpush1.bf16.msra.mxu0 %v3725_v55  ;;  %v122_v21 = vld [vmem:[#allocation6 + $0x1b0] sm:$0xff]  ;;  %v3749_v23 = vpack.c.bf16 %v112_v12, %v108_v11  ;;  %v127_v24 = vld [vmem:[#allocation6 + $0x1d8] sm:$0xff]  ;;  %v3752_v28 = vpack.c.bf16 %v121_v16, %v117_v15  ;;  %v116_v29 = vld [vmem:[#allocation6 + $0x180] sm:$0xff] }
  0x38   :  { %2856 = vmatprep.subr.bf16.mxu0 %v3728_v58  ;;  %v131_v25 = vld [vmem:[#allocation6 + $0x1f8] sm:$0xff]  ;;  %v120_v30 = vld [vmem:[#allocation6 + $0x1a0] sm:$0xff]  ;;  %v3755_v31 = vpack.c.bf16 %v122_v21, %v118_v20  ;;  %v125_v32 = vld [vmem:[#allocation6 + $0x1c8] sm:$0xff]  ;;  %v423_v7 = vshrl.u32 %v422_v6, 7 }
  0x39   :  { %v129_v33 = vld [vmem:[#allocation6 + $0x1e8] sm:$0xff]  ;;  %v3758_v36 = vpack.c.bf16 %v131_v25, %v127_v24  ;;  %v126_v37 = vld [vmem:[#allocation6 + $0x1d0] sm:$0xff]  ;;  %v3761_v40 = vpack.c.bf16 %v120_v30, %v116_v29  ;;  %v124_v45 = vld [vmem:[#allocation6 + $0x1c0] sm:$0xff] }
  0x3a   :  { %2890 = vmatpush1.bf16.msra.mxu1 %v3731_v61  ;;  %v130_v38 = vld [vmem:[#allocation6 + $0x1f0] sm:$0xff]  ;;  %v61_v41 = vld [vmem:[#allocation4 + $0x8] sm:$0xff]  ;;  %v3764_v44 = vpack.c.bf16 %v129_v33, %v125_v32  ;;  %v128_v47 = vld [vmem:[#allocation6 + $0x1e0] sm:$0xff]  ;;  %v424_v11 = vsub.s32 0, %v423_v7  ;;  %v428_v15 = vsub.s32 1, %v423_v7  ;;  %v432_v24 = vsub.s32 2, %v423_v7 }
  0x3b   :  { %2892 = vmatprep.subr.bf16.mxu1 %v3734_v1  ;;  %2858 = vmatpush1.bf16.msra.mxu0 %v3737_v5  ;;  %v65_v42 = vld [vmem:[#allocation4 + $0x28] sm:$0xff]  ;;  %v3767_v48 = vpack.c.bf16 %v130_v38, %v126_v37  ;;  %v60_v51 = vld [vmem:[#allocation4] sm:$0xff]  ;;  %v3773_v54 = vpack.c.bf16 %v128_v47, %v124_v45  ;;  %v63_v56 = vld [vmem:[#allocation4 + $0x18] sm:$0xff] }
  0x3c   :  { %2860 = vmatprep.subr.bf16.mxu0 %v3740_v10  ;;  %v3770_v50 = vpack.c.bf16 %v65_v42, %v61_v41  ;;  %v64_v53 = vld [vmem:[#allocation4 + $0x20] sm:$0xff]  ;;  %v67_v57 = vld [vmem:[#allocation4 + $0x38] sm:$0xff]  ;;  %v62_v62 = vld [vmem:[#allocation4 + $0x10] sm:$0xff]  ;;  %v436_v41 = vsub.s32 3, %v423_v7 }
  0x3d   :  { %v3777_v59 = vpack.c.bf16 %v64_v53, %v60_v51  ;;  %v3780_v60 = vpack.c.bf16 %v67_v57, %v63_v56  ;;  %v66_v63 = vld [vmem:[#allocation4 + $0x30] sm:$0xff]  ;;  %v59_v2 = vld [vmem:[%s4242_s0] sm:$0xff] }
  0x3e   :  { %2894 = vmatpush1.bf16.msra.mxu1 %v3743_v14  ;;  %v3790_v3 = vpack.c.bf16 %v66_v63, %v62_v62  ;;  %v420_v12 = vld [vmem:[%s4245_s3] sm:$0xf] }
  0x3f   :  { %2896 = vmatprep.subr.bf16.mxu1 %v3746_v19  ;;  %2862 = vmatpush1.bf16.msra.mxu0 %v3749_v23  ;;  %v3837_v20 = vrot.slane %v420_v12, %v424_v11  ;;  %v3839_v29 = vrot.slane %v420_v12, %v428_v15  ;;  %v3842_v38 = vrot.slane %v420_v12, %v432_v24 }
  0x40   :  { %2864 = vmatprep.subr.bf16.mxu0 %v3752_v28  ;;  %v3846_v57 = vrot.slane %v420_v12, %v436_v41 }
  0x42   :  { %2898 = vmatpush1.bf16.msra.mxu1 %v3755_v31 }
  0x43   :  { %2900 = vmatprep.subr.bf16.mxu1 %v3758_v36  ;;  %2866 = vmatpush1.bf16.msra.mxu0 %v3761_v40 }
  0x44   :  { %2868 = vmatprep.subr.bf16.mxu0 %v3764_v44 }
  0x46   :  { %2902 = vmatpush1.bf16.msra.mxu1 %v3767_v48 }
  0x47   :  { %2904 = vmatprep.subr.bf16.mxu1 %v3770_v50  ;;  %2870 = vmatpush1.bf16.msra.mxu0 %v3773_v54 }
  0x48   :  { %2912 = vmatprep.subr.bf16.mxu0 %v3684_v9 }
  0x49   :  { %268 = vmatmul.mubr.f32.vlgmr.msra.gmra.mrb[0].mxu1 %v3616_v0 }
  0x4a   :  { %2906 = vmatpush1.bf16.msra.mxu1 %v3777_v59  ;;  %342 = vmatprep.mubr.f32.mxu1 %v3616_v0 }
  0x4b   :  { %197 = vmatmul.mubr.f32.vlgmr.msra.gmra.mrb[0].mxu0 %v3616_v0  ;;  %2908 = vmatprep.subr.bf16.mxu1 %v3780_v60 }
  0x4c   :  { %2914 = vmatpush1.bf16.msra.mxu0 %v3691_v17  ;;  %530 = vmatprep.mubr.f32.mxu0 %v3616_v0 }
  0x4d   :  { %2763 = vmatmul.mubr.msk.f32.vlgmr.msra.gmra.mrb[2].mxu1 %vm274_vm0, %v59_v2  ;;  %2916 = vmatprep.subr.bf16.mxu0 %v3696_v22 }
  0x4e   :  { %2910 = vmatpush1.bf16.msra.mxu1 %v3790_v3  ;;  %413 = vmatprep.mubr.f32.mxu1 %v3616_v0 }
  0x4f   :  { %2944 = vmatprep.subr.bf16.mxu1 %v3680_v4 }
  0x50   :  { %2918 = vmatpush1.bf16.msra.mxu0 %v3701_v27 }
  0x51   :  { %2764 = vmatmul.mubr.msk.f32.vlgmr.msra.gmra.mrb[0].mxu1 %vm274_vm0, %v59_v2  ;;  %2920 = vmatprep.subr.bf16.mxu0 %v3707_v35 }
  0x52   :  { %2946 = vmatpush1.bf16.msra.mxu1 %v3682_v8  ;;  %601 = vmatprep.mubr.f32.mxu1 %v3616_v0 }
  0x53   :  { %2948 = vmatprep.subr.bf16.mxu1 %v3687_v13 }
  0x54   :  { %2922 = vmatpush1.bf16.msra.mxu0 %v3713_v43 }
  0x55   :  { %2924 = vmatprep.subr.bf16.mxu0 %v3716_v46 }
  0x56   :  { %2950 = vmatpush1.bf16.msra.mxu1 %v3693_v18 }
  0x57   :  { %2952 = vmatprep.subr.bf16.mxu1 %v3699_v26 }
  0x58   :  { %2926 = vmatpush1.bf16.msra.mxu0 %v3725_v55 }
  0x59   :  { %2928 = vmatprep.subr.bf16.mxu0 %v3728_v58 }
  0x5a   :  { %2954 = vmatpush1.bf16.msra.mxu1 %v3705_v34 }
  0x5b   :  { %2956 = vmatprep.subr.bf16.mxu1 %v3710_v39 }
  0x5c   :  { %2930 = vmatpush1.bf16.msra.mxu0 %v3737_v5 }
  0x5d   :  { %2932 = vmatprep.subr.bf16.mxu0 %v3740_v10 }
  0x5e   :  { %2958 = vmatpush1.bf16.msra.mxu1 %v3719_v49 }
  0x5f   :  { %2960 = vmatprep.subr.bf16.mxu1 %v3722_v52 }
  0x60   :  { %2934 = vmatpush1.bf16.msra.mxu0 %v3749_v23 }
  0x61   :  { %2936 = vmatprep.subr.bf16.mxu0 %v3752_v28 }
  0x62   :  { %2962 = vmatpush1.bf16.msra.mxu1 %v3731_v61 }
  0x63   :  { %2964 = vmatprep.subr.bf16.mxu1 %v3734_v1 }
  0x64   :  { %2938 = vmatpush1.bf16.msra.mxu0 %v3761_v40 }
  0x65   :  { %2940 = vmatprep.subr.bf16.mxu0 %v3764_v44 }
  0x66   :  { %2966 = vmatpush1.bf16.msra.mxu1 %v3743_v14 }
  0x67   :  { %2968 = vmatprep.subr.bf16.mxu1 %v3746_v19 }
  0x68   :  { %2942 = vmatpush1.bf16.msra.mxu0 %v3773_v54 }
  0x69   :  { %2984 = vmatprep.subr.bf16.mxu0 %v3684_v9 }
  0x6a   :  { %2970 = vmatpush1.bf16.msra.mxu1 %v3755_v31 }
  0x6b   :  { %2972 = vmatprep.subr.bf16.mxu1 %v3758_v36 }
  0x6e   :  { %2974 = vmatpush1.bf16.msra.mxu1 %v3767_v48 }
  0x6f   :  { %2976 = vmatprep.subr.bf16.mxu1 %v3770_v50 }
 0x11e   :  { %v198_v16 = vpop.f32.mrb[0].mxu0 }
 0x11f   :  { %v200_v21 = vpop.f32.mrb[1].mxu0 }
 0x120   :  { %v344_v25 = vpop.f32.mrb[2].mxu1 }
 0x121   :  { %v345_v30 = vadd.f32 %v344_v25, %v198_v16  ;;  %v346_v32 = vpop.f32.mrb[3].mxu1 }
 0x122   :  { %v347_v33 = vadd.f32 %v346_v32, %v200_v21 }
 0x123   :  { %v442_v37 = vadd.f32 %v3837_v20, %v345_v30 }
 0x124   :  { %v443_v42 = vadd.f32 %v3839_v29, %v347_v33  ;;  %v415_v45 = vpop.f32.mrb[0].mxu1 }
 0x125   :  { %v446_v47 = vmul.f32 0.5, %v442_v37  ;;  %v417_v51 = vpop.f32.mrb[1].mxu1  ;;  %v444_v56 = vadd.f32 %v3842_v38, %v415_v45  ;;  %v2765_v45 = vld [vmem:[%s4242_s0 + $0x8] sm:$0xff] }
 0x126   :  { %v450_v53 = vmul.f32 0.5, %v443_v42  ;;  %v445_v62 = vadd.f32 %v3846_v57, %v417_v51 }
 0x127   :  { %3478 = vtanh.f32 %v446_v47 }
 0x128   :  { %3480 = vtanh.f32 %v450_v53  ;;  %v455_v63 = vmul.f32 0.5, %v445_v62 }
 0x129   :  { %3482 = vtanh.f32 %v444_v56 }
 0x12a   :  { %3484 = vtanh.f32 %v455_v63 }
 0x131   :  { %v3479_v2 = vpop.eup %3478 }
 0x132   :  { %v3481_v11 = vpop.eup %3480  ;;  %v448_v15 = vmul.f32 0.5, %v3479_v2 }
 0x133   :  { %v452_v7 = vmul.f32 0.5, %v3481_v11  ;;  %v3483_v21 = vpop.eup %3482 }
 0x134   :  { %v449_v16 = vadd.f32 0.5, %v448_v15  ;;  %v3485_v12 = vpop.eup %3484 }
 0x135   :  { %v453_v24 = vadd.f32 0.5, %v452_v7  ;;  %v457_v33 = vmul.f32 0.5, %v3485_v12 }
 0x136   :  { %v460_v25 = vmul.f32 %v3483_v21, %v449_v16 }
 0x137   :  { %v459_v30 = vmul.f32 0.0, %v453_v24  ;;  %v458_v37 = vadd.f32 0.5, %v457_v33 }
 0x139   :  { %v3849_v32 = vadd.f32 %v460_v25, %v459_v30 }
 0x13b   :  { %3486 = vtanh.f32 %v3849_v32 }
 0x145   :  { %v3487_v41 = vpop.eup %3486 }
 0x146   :  { %v463_v42 = vmul.f32 %v3487_v41, %v458_v37 }
 0x148   :  { %531 = vmatmul.mubr.f32.vlgmr.msra.gmra.mrb[2].mxu0 %v463_v42  ;;  %602 = vmatmul.mubr.f32.vlgmr.msra.gmra.mrb[4].mxu1 %v463_v42 }
 0x149   :  { %2978 = vmatpush1.bf16.msra.mxu1 %v3777_v59  ;;  %675 = vmatprep.mubr.f32.mxu1 %v3616_v0 }
 0x14a   :  { %2980 = vmatprep.subr.bf16.mxu1 %v3780_v60  ;;  %2986 = vmatpush1.bf16.msra.mxu0 %v3691_v17 }
 0x14b   :  { %2988 = vmatprep.subr.bf16.mxu0 %v3696_v22  ;;  %841 = vmatprep.mubr.f32.mxu0 %v3616_v0 }
 0x14c   :  { %2766 = vmatmul.mubr.msk.f32.vlgmr.msra.gmra.mrb[6].mxu1 %vm274_vm0, %v2765_v45 }
 0x14d   :  { %2982 = vmatpush1.bf16.msra.mxu1 %v3790_v3  ;;  %746 = vmatprep.mubr.f32.mxu1 %v3616_v0 }
 0x14e   :  { %3016 = vmatprep.subr.bf16.mxu1 %v3680_v4  ;;  %2990 = vmatpush1.bf16.msra.mxu0 %v3701_v27 }
 0x14f   :  { %2992 = vmatprep.subr.bf16.mxu0 %v3707_v35 }
 0x150   :  { %2767 = vmatmul.mubr.msk.f32.vlgmr.msra.gmra.mrb[4].mxu1 %vm274_vm0, %v2765_v45 }
 0x151   :  { %3018 = vmatpush1.bf16.msra.mxu1 %v3682_v8  ;;  %912 = vmatprep.mubr.f32.mxu1 %v3616_v0 }
 0x152   :  { %3020 = vmatprep.subr.bf16.mxu1 %v3687_v13  ;;  %2994 = vmatpush1.bf16.msra.mxu0 %v3713_v43 }
 0x153   :  { %2996 = vmatprep.subr.bf16.mxu0 %v3716_v46 }
 0x155   :  { %3022 = vmatpush1.bf16.msra.mxu1 %v3693_v18 }
 0x156   :  { %3024 = vmatprep.subr.bf16.mxu1 %v3699_v26  ;;  %2998 = vmatpush1.bf16.msra.mxu0 %v3725_v55 }
 0x157   :  { %3000 = vmatprep.subr.bf16.mxu0 %v3728_v58 }
 0x159   :  { %3026 = vmatpush1.bf16.msra.mxu1 %v3705_v34 }
 0x15a   :  { %3028 = vmatprep.subr.bf16.mxu1 %v3710_v39  ;;  %3002 = vmatpush1.bf16.msra.mxu0 %v3737_v5 }
 0x15b   :  { %3004 = vmatprep.subr.bf16.mxu0 %v3740_v10 }
 0x15d   :  { %3030 = vmatpush1.bf16.msra.mxu1 %v3719_v49 }
 0x15e   :  { %3032 = vmatprep.subr.bf16.mxu1 %v3722_v52  ;;  %3006 = vmatpush1.bf16.msra.mxu0 %v3749_v23 }
 0x15f   :  { %3008 = vmatprep.subr.bf16.mxu0 %v3752_v28 }
 0x161   :  { %3034 = vmatpush1.bf16.msra.mxu1 %v3731_v61 }
 0x162   :  { %3036 = vmatprep.subr.bf16.mxu1 %v3734_v1  ;;  %3010 = vmatpush1.bf16.msra.mxu0 %v3761_v40 }
 0x163   :  { %3012 = vmatprep.subr.bf16.mxu0 %v3764_v44 }
 0x165   :  { %3038 = vmatpush1.bf16.msra.mxu1 %v3743_v14 }
 0x166   :  { %3040 = vmatprep.subr.bf16.mxu1 %v3746_v19  ;;  %3014 = vmatpush1.bf16.msra.mxu0 %v3773_v54 }
 0x167   :  { %3056 = vmatprep.subr.bf16.mxu0 %v3684_v9 }
 0x169   :  { %3042 = vmatpush1.bf16.msra.mxu1 %v3755_v31 }
 0x16a   :  { %3044 = vmatprep.subr.bf16.mxu1 %v3758_v36 }
 0x16d   :  { %3046 = vmatpush1.bf16.msra.mxu1 %v3767_v48 }
 0x16e   :  { %3048 = vmatprep.subr.bf16.mxu1 %v3770_v50 }
 0x21b   :  { %v532_v47 = vpop.f32.mrb[2].mxu0 }
 0x21c   :  { %v534_v51 = vpop.f32.mrb[3].mxu0 }
 0x21f   :  { %v677_v53 = vpop.f32.mrb[6].mxu1 }
 0x220   :  { %v678_v56 = vadd.f32 %v677_v53, %v532_v47  ;;  %v679_v62 = vpop.f32.mrb[7].mxu1 }
 0x221   :  { %v680_v63 = vadd.f32 %v679_v62, %v534_v51 }
 0x222   :  { %v753_v2 = vadd.f32 %v678_v56, %v3837_v20 }
 0x223   :  { %v754_v11 = vadd.f32 %v680_v63, %v3839_v29  ;;  %v748_v15 = vpop.f32.mrb[4].mxu1 }
 0x224   :  { %v757_v7 = vmul.f32 0.5, %v753_v2  ;;  %v750_v16 = vpop.f32.mrb[5].mxu1  ;;  %v755_v24 = vadd.f32 %v748_v15, %v3842_v38 }
 0x225   :  { %v761_v21 = vmul.f32 0.5, %v754_v11  ;;  %v756_v25 = vadd.f32 %v750_v16, %v3846_v57 }
 0x226   :  { %3488 = vtanh.f32 %v757_v7  ;;  %v2768_v7 = vld [vmem:[%s4242_s0 + $0x10] sm:$0xff] }
 0x227   :  { %3490 = vtanh.f32 %v761_v21  ;;  %v766_v30 = vmul.f32 0.5, %v756_v25 }
 0x228   :  { %3492 = vtanh.f32 %v755_v24 }
 0x229   :  { %3494 = vtanh.f32 %v766_v30 }
 0x230   :  { %v3489_v12 = vpop.eup %3488 }
 0x231   :  { %v3491_v33 = vpop.eup %3490  ;;  %v759_v37 = vmul.f32 0.5, %v3489_v12 }
 0x232   :  { %v763_v41 = vmul.f32 0.5, %v3491_v33  ;;  %v3493_v45 = vpop.eup %3492 }
 0x233   :  { %v760_v42 = vadd.f32 0.5, %v759_v37  ;;  %v3495_v62 = vpop.eup %3494 }
 0x234   :  { %v764_v47 = vadd.f32 0.5, %v763_v41  ;;  %v768_v63 = vmul.f32 0.5, %v3495_v62 }
 0x235   :  { %v771_v51 = vmul.f32 %v3493_v45, %v760_v42 }
 0x236   :  { %v770_v53 = vmul.f32 %v764_v47, %v3849_v32  ;;  %v769_v2 = vadd.f32 0.5, %v768_v63 }
 0x238   :  { %v3902_v56 = vadd.f32 %v771_v51, %v770_v53 }
 0x23a   :  { %3496 = vtanh.f32 %v3902_v56 }
 0x244   :  { %v3497_v11 = vpop.eup %3496 }
 0x245   :  { %v774_v15 = vmul.f32 %v3497_v11, %v769_v2 }
 0x247   :  { %842 = vmatmul.mubr.f32.vlgmr.msra.gmra.mrb[4].mxu0 %v774_v15  ;;  %913 = vmatmul.mubr.f32.vlgmr.msra.gmra.mrb[8].mxu1 %v774_v15 }
 0x248   :  { %3050 = vmatpush1.bf16.msra.mxu1 %v3777_v59  ;;  %986 = vmatprep.mubr.f32.mxu1 %v3616_v0 }
 0x249   :  { %3052 = vmatprep.subr.bf16.mxu1 %v3780_v60  ;;  %3058 = vmatpush1.bf16.msra.mxu0 %v3691_v17 }
 0x24a   :  { %3060 = vmatprep.subr.bf16.mxu0 %v3696_v22  ;;  %1152 = vmatprep.mubr.f32.mxu0 %v3616_v0 }
 0x24b   :  { %2769 = vmatmul.mubr.msk.f32.vlgmr.msra.gmra.mrb[10].mxu1 %vm274_vm0, %v2768_v7 }
 0x24c   :  { %3054 = vmatpush1.bf16.msra.mxu1 %v3790_v3  ;;  %1057 = vmatprep.mubr.f32.mxu1 %v3616_v0 }
 0x24d   :  { %3088 = vmatprep.subr.bf16.mxu1 %v3680_v4  ;;  %3062 = vmatpush1.bf16.msra.mxu0 %v3701_v27 }
 0x24e   :  { %3064 = vmatprep.subr.bf16.mxu0 %v3707_v35 }
 0x24f   :  { %2770 = vmatmul.mubr.msk.f32.vlgmr.msra.gmra.mrb[8].mxu1 %vm274_vm0, %v2768_v7 }
 0x250   :  { %3090 = vmatpush1.bf16.msra.mxu1 %v3682_v8  ;;  %1223 = vmatprep.mubr.f32.mxu1 %v3616_v0 }
 0x251   :  { %3092 = vmatprep.subr.bf16.mxu1 %v3687_v13  ;;  %3066 = vmatpush1.bf16.msra.mxu0 %v3713_v43 }
 0x252   :  { %3068 = vmatprep.subr.bf16.mxu0 %v3716_v46 }
 0x254   :  { %3094 = vmatpush1.bf16.msra.mxu1 %v3693_v18 }
 0x255   :  { %3096 = vmatprep.subr.bf16.mxu1 %v3699_v26  ;;  %3070 = vmatpush1.bf16.msra.mxu0 %v3725_v55 }
 0x256   :  { %3072 = vmatprep.subr.bf16.mxu0 %v3728_v58 }
 0x258   :  { %3098 = vmatpush1.bf16.msra.mxu1 %v3705_v34 }
 0x259   :  { %3100 = vmatprep.subr.bf16.mxu1 %v3710_v39  ;;  %3074 = vmatpush1.bf16.msra.mxu0 %v3737_v5 }
 0x25a   :  { %3076 = vmatprep.subr.bf16.mxu0 %v3740_v10 }
 0x25c   :  { %3102 = vmatpush1.bf16.msra.mxu1 %v3719_v49 }
 0x25d   :  { %3104 = vmatprep.subr.bf16.mxu1 %v3722_v52  ;;  %3078 = vmatpush1.bf16.msra.mxu0 %v3749_v23 }
 0x25e   :  { %3080 = vmatprep.subr.bf16.mxu0 %v3752_v28 }
 0x260   :  { %3106 = vmatpush1.bf16.msra.mxu1 %v3731_v61 }
 0x261   :  { %3108 = vmatprep.subr.bf16.mxu1 %v3734_v1  ;;  %3082 = vmatpush1.bf16.msra.mxu0 %v3761_v40 }
 0x262   :  { %3084 = vmatprep.subr.bf16.mxu0 %v3764_v44 }
 0x264   :  { %3110 = vmatpush1.bf16.msra.mxu1 %v3743_v14 }
 0x265   :  { %3112 = vmatprep.subr.bf16.mxu1 %v3746_v19  ;;  %3086 = vmatpush1.bf16.msra.mxu0 %v3773_v54 }
 0x266   :  { %3128 = vmatprep.subr.bf16.mxu0 %v3684_v9 }
 0x268   :  { %3114 = vmatpush1.bf16.msra.mxu1 %v3755_v31 }
 0x269   :  { %3116 = vmatprep.subr.bf16.mxu1 %v3758_v36 }
 0x26c   :  { %3118 = vmatpush1.bf16.msra.mxu1 %v3767_v48 }
 0x26d   :  { %3120 = vmatprep.subr.bf16.mxu1 %v3770_v50 }
 0x31a   :  { %v843_v32 = vpop.f32.mrb[4].mxu0 }
 0x31b   :  { %v845_v16 = vpop.f32.mrb[5].mxu0 }
 0x31e   :  { %v988_v21 = vpop.f32.mrb[10].mxu1 }
 0x31f   :  { %v989_v24 = vadd.f32 %v988_v21, %v843_v32  ;;  %v990_v25 = vpop.f32.mrb[11].mxu1 }
 0x320   :  { %v991_v30 = vadd.f32 %v990_v25, %v845_v16 }
 0x321   :  { %v1064_v12 = vadd.f32 %v989_v24, %v3837_v20 }
 0x322   :  { %v1065_v33 = vadd.f32 %v991_v30, %v3839_v29  ;;  %v1059_v37 = vpop.f32.mrb[8].mxu1 }
 0x323   :  { %v1068_v41 = vmul.f32 0.5, %v1064_v12  ;;  %v1061_v42 = vpop.f32.mrb[9].mxu1  ;;  %v1066_v47 = vadd.f32 %v1059_v37, %v3842_v38 }
 0x324   :  { %v1072_v45 = vmul.f32 0.5, %v1065_v33  ;;  %v1067_v51 = vadd.f32 %v1061_v42, %v3846_v57 }
 0x325   :  { %3498 = vtanh.f32 %v1068_v41  ;;  %v2771_v41 = vld [vmem:[%s4242_s0 + $0x18] sm:$0xff] }
 0x326   :  { %3500 = vtanh.f32 %v1072_v45  ;;  %v1077_v53 = vmul.f32 0.5, %v1067_v51 }
 0x327   :  { %3502 = vtanh.f32 %v1066_v47 }
 0x328   :  { %3504 = vtanh.f32 %v1077_v53 }
 0x32f   :  { %v3499_v62 = vpop.eup %3498 }
 0x330   :  { %v3501_v63 = vpop.eup %3500  ;;  %v1070_v2 = vmul.f32 0.5, %v3499_v62 }
 0x331   :  { %v1074_v11 = vmul.f32 0.5, %v3501_v63  ;;  %v3503_v7 = vpop.eup %3502 }
 0x332   :  { %v1071_v15 = vadd.f32 0.5, %v1070_v2  ;;  %v3505_v25 = vpop.eup %3504 }
 0x333   :  { %v1075_v32 = vadd.f32 0.5, %v1074_v11  ;;  %v1079_v30 = vmul.f32 0.5, %v3505_v25 }
 0x334   :  { %v1082_v16 = vmul.f32 %v3503_v7, %v1071_v15 }
 0x335   :  { %v1081_v21 = vmul.f32 %v1075_v32, %v3902_v56  ;;  %v1080_v12 = vadd.f32 0.5, %v1079_v30 }
 0x337   :  { %v3955_v24 = vadd.f32 %v1082_v16, %v1081_v21 }
 0x339   :  { %3506 = vtanh.f32 %v3955_v24 }
 0x343   :  { %v3507_v33 = vpop.eup %3506 }
 0x344   :  { %v1085_v37 = vmul.f32 %v3507_v33, %v1080_v12 }
 0x346   :  { %1153 = vmatmul.mubr.f32.vlgmr.msra.gmra.mrb[6].mxu0 %v1085_v37  ;;  %1224 = vmatmul.mubr.f32.vlgmr.msra.gmra.mrb[12].mxu1 %v1085_v37 }
 0x347   :  { %3122 = vmatpush1.bf16.msra.mxu1 %v3777_v59  ;;  %1297 = vmatprep.mubr.f32.mxu1 %v3616_v0 }
 0x348   :  { %3124 = vmatprep.subr.bf16.mxu1 %v3780_v60  ;;  %3130 = vmatpush1.bf16.msra.mxu0 %v3691_v17 }
 0x349   :  { %3132 = vmatprep.subr.bf16.mxu0 %v3696_v22  ;;  %1463 = vmatprep.mubr.f32.mxu0 %v3616_v0 }
 0x34a   :  { %2772 = vmatmul.mubr.msk.f32.vlgmr.msra.gmra.mrb[14].mxu1 %vm274_vm0, %v2771_v41 }
 0x34b   :  { %3126 = vmatpush1.bf16.msra.mxu1 %v3790_v3  ;;  %1368 = vmatprep.mubr.f32.mxu1 %v3616_v0 }
 0x34c   :  { %3160 = vmatprep.subr.bf16.mxu1 %v3680_v4  ;;  %3134 = vmatpush1.bf16.msra.mxu0 %v3701_v27 }
 0x34d   :  { %3136 = vmatprep.subr.bf16.mxu0 %v3707_v35 }
 0x34e   :  { %2773 = vmatmul.mubr.msk.f32.vlgmr.msra.gmra.mrb[12].mxu1 %vm274_vm0, %v2771_v41 }
 0x34f   :  { %3162 = vmatpush1.bf16.msra.mxu1 %v3682_v8  ;;  %1534 = vmatprep.mubr.f32.mxu1 %v3616_v0 }
 0x350   :  { %3164 = vmatprep.subr.bf16.mxu1 %v3687_v13  ;;  %3138 = vmatpush1.bf16.msra.mxu0 %v3713_v43 }
 0x351   :  { %3140 = vmatprep.subr.bf16.mxu0 %v3716_v46 }
 0x353   :  { %3166 = vmatpush1.bf16.msra.mxu1 %v3693_v18 }
 0x354   :  { %3168 = vmatprep.subr.bf16.mxu1 %v3699_v26  ;;  %3142 = vmatpush1.bf16.msra.mxu0 %v3725_v55 }
 0x355   :  { %3144 = vmatprep.subr.bf16.mxu0 %v3728_v58 }
 0x357   :  { %3170 = vmatpush1.bf16.msra.mxu1 %v3705_v34 }
 0x358   :  { %3172 = vmatprep.subr.bf16.mxu1 %v3710_v39  ;;  %3146 = vmatpush1.bf16.msra.mxu0 %v3737_v5 }
 0x359   :  { %3148 = vmatprep.subr.bf16.mxu0 %v3740_v10 }
 0x35b   :  { %3174 = vmatpush1.bf16.msra.mxu1 %v3719_v49 }
 0x35c   :  { %3176 = vmatprep.subr.bf16.mxu1 %v3722_v52  ;;  %3150 = vmatpush1.bf16.msra.mxu0 %v3749_v23 }
 0x35d   :  { %3152 = vmatprep.subr.bf16.mxu0 %v3752_v28 }
 0x35f   :  { %3178 = vmatpush1.bf16.msra.mxu1 %v3731_v61 }
 0x360   :  { %3180 = vmatprep.subr.bf16.mxu1 %v3734_v1  ;;  %3154 = vmatpush1.bf16.msra.mxu0 %v3761_v40 }
 0x361   :  { %3156 = vmatprep.subr.bf16.mxu0 %v3764_v44 }
 0x363   :  { %3182 = vmatpush1.bf16.msra.mxu1 %v3743_v14 }
 0x364   :  { %3184 = vmatprep.subr.bf16.mxu1 %v3746_v19  ;;  %3158 = vmatpush1.bf16.msra.mxu0 %v3773_v54 }
 0x365   :  { %3192 = vmatprep.subr.bf16.mxu0 %v3770_v50 }
 0x367   :  { %3186 = vmatpush1.bf16.msra.mxu1 %v3755_v31 }
 0x368   :  { %3188 = vmatprep.subr.bf16.mxu1 %v3758_v36 }
 0x36b   :  { %3190 = vmatpush1.bf16.msra.mxu1 %v3767_v48 }
 0x36c   :  { %3196 = vmatprep.subr.bf16.mxu1 %v3780_v60 }
 0x419   :  { %v1154_v56 = vpop.f32.mrb[6].mxu0 }
 0x41a   :  { %v1156_v42 = vpop.f32.mrb[7].mxu0 }
 0x41d   :  { %v1299_v45 = vpop.f32.mrb[14].mxu1 }
 0x41e   :  { %v1300_v47 = vadd.f32 %v1299_v45, %v1154_v56  ;;  %v1301_v51 = vpop.f32.mrb[15].mxu1 }
 0x41f   :  { %v1302_v53 = vadd.f32 %v1301_v51, %v1156_v42 }
 0x420   :  { %v1375_v62 = vadd.f32 %v1300_v47, %v3837_v20 }
 0x421   :  { %v1376_v63 = vadd.f32 %v1302_v53, %v3839_v29  ;;  %v1370_v2 = vpop.f32.mrb[12].mxu1 }
 0x422   :  { %v1379_v11 = vmul.f32 0.5, %v1375_v62  ;;  %v1372_v15 = vpop.f32.mrb[13].mxu1  ;;  %v1377_v32 = vadd.f32 %v1370_v2, %v3842_v38 }
 0x423   :  { %v1383_v7 = vmul.f32 0.5, %v1376_v63  ;;  %v1378_v16 = vadd.f32 %v1372_v15, %v3846_v57 }
 0x424   :  { %3508 = vtanh.f32 %v1379_v11 }
 0x425   :  { %3510 = vtanh.f32 %v1383_v7  ;;  %v1388_v21 = vmul.f32 0.5, %v1378_v16 }
 0x426   :  { %3512 = vtanh.f32 %v1377_v32 }
 0x427   :  { %3514 = vtanh.f32 %v1388_v21 }
 0x42e   :  { %v3509_v25 = vpop.eup %3508 }
 0x42f   :  { %v3511_v30 = vpop.eup %3510  ;;  %v1381_v12 = vmul.f32 0.5, %v3509_v25 }
 0x430   :  { %v1385_v33 = vmul.f32 0.5, %v3511_v30  ;;  %v3513_v41 = vpop.eup %3512 }
 0x431   :  { %v1382_v37 = vadd.f32 0.5, %v1381_v12  ;;  %v3515_v51 = vpop.eup %3514 }
 0x432   :  { %v1386_v56 = vadd.f32 0.5, %v1385_v33  ;;  %v1390_v53 = vmul.f32 0.5, %v3515_v51 }
 0x433   :  { %v1393_v42 = vmul.f32 %v3513_v41, %v1382_v37 }
 0x434   :  { %v1392_v45 = vmul.f32 %v1386_v56, %v3955_v24  ;;  %v1391_v62 = vadd.f32 0.5, %v1390_v53  ;;  %v2774_v24 = vld [vmem:[%s4242_s0 + $0x20] sm:$0xff] }
 0x436   :  { %v4008_v47 = vadd.f32 %v1393_v42, %v1392_v45 }
 0x438   :  { %3516 = vtanh.f32 %v4008_v47 }
 0x442   :  { %v3517_v63 = vpop.eup %3516 }
 0x443   :  { %v1396_v2 = vmul.f32 %v3517_v63, %v1391_v62 }
 0x445   :  { %1464 = vmatmul.mubr.f32.vlgmr.msra.gmra.mrb[8].mxu0 %v1396_v2  ;;  %1535 = vmatmul.mubr.f32.vlgmr.msra.gmra.mrb[16].mxu1 %v1396_v2 }
 0x446   :  { %3194 = vmatpush1.bf16.msra.mxu0 %v3777_v59  ;;  %3198 = vmatpush1.bf16.msra.mxu1 %v3790_v3 }
 0x447   :  { %1608 = vmatprep.mubr.f32.mxu0 %v3616_v0  ;;  %1679 = vmatprep.mubr.f32.mxu1 %v3616_v0 }
 0x448   :  { %3200 = vmatprep.subr.bf16.mxu0 %v3684_v9  ;;  %3232 = vmatprep.subr.bf16.mxu1 %v3680_v4 }
 0x44d   :  { %2775 = vmatmul.mubr.msk.f32.vlgmr.msra.gmra.mrb[8].mxu0 %vm274_vm0, %v2774_v24  ;;  %2776 = vmatmul.mubr.msk.f32.vlgmr.msra.gmra.mrb[16].mxu1 %vm274_vm0, %v2774_v24 }
 0x44e   :  { %3202 = vmatpush1.bf16.msra.mxu0 %v3691_v17  ;;  %3234 = vmatpush1.bf16.msra.mxu1 %v3682_v8 }
 0x44f   :  { %3204 = vmatprep.subr.bf16.mxu0 %v3696_v22  ;;  %3236 = vmatprep.subr.bf16.mxu1 %v3687_v13 }
 0x450   :  { %1774 = vmatprep.mubr.f32.mxu0 %v3616_v0  ;;  %1845 = vmatprep.mubr.f32.mxu1 %v3616_v0 }
 0x452   :  { %3206 = vmatpush1.bf16.msra.mxu0 %v3701_v27  ;;  %3238 = vmatpush1.bf16.msra.mxu1 %v3693_v18 }
 0x453   :  { %3208 = vmatprep.subr.bf16.mxu0 %v3707_v35  ;;  %3240 = vmatprep.subr.bf16.mxu1 %v3699_v26 }
 0x456   :  { %3210 = vmatpush1.bf16.msra.mxu0 %v3713_v43  ;;  %3242 = vmatpush1.bf16.msra.mxu1 %v3705_v34 }
 0x457   :  { %3212 = vmatprep.subr.bf16.mxu0 %v3716_v46  ;;  %3244 = vmatprep.subr.bf16.mxu1 %v3710_v39 }
 0x45a   :  { %3214 = vmatpush1.bf16.msra.mxu0 %v3725_v55  ;;  %3246 = vmatpush1.bf16.msra.mxu1 %v3719_v49 }
 0x45b   :  { %3216 = vmatprep.subr.bf16.mxu0 %v3728_v58  ;;  %3248 = vmatprep.subr.bf16.mxu1 %v3722_v52 }
 0x45e   :  { %3218 = vmatpush1.bf16.msra.mxu0 %v3737_v5  ;;  %3250 = vmatpush1.bf16.msra.mxu1 %v3731_v61 }
 0x45f   :  { %3220 = vmatprep.subr.bf16.mxu0 %v3740_v10  ;;  %3252 = vmatprep.subr.bf16.mxu1 %v3734_v1 }
 0x462   :  { %3222 = vmatpush1.bf16.msra.mxu0 %v3749_v23  ;;  %3254 = vmatpush1.bf16.msra.mxu1 %v3743_v14 }
 0x463   :  { %3224 = vmatprep.subr.bf16.mxu0 %v3752_v28  ;;  %3256 = vmatprep.subr.bf16.mxu1 %v3746_v19 }
 0x466   :  { %3226 = vmatpush1.bf16.msra.mxu0 %v3761_v40  ;;  %3258 = vmatpush1.bf16.msra.mxu1 %v3755_v31 }
 0x467   :  { %3228 = vmatprep.subr.bf16.mxu0 %v3764_v44  ;;  %3260 = vmatprep.subr.bf16.mxu1 %v3758_v36 }
 0x46a   :  { %3230 = vmatpush1.bf16.msra.mxu0 %v3773_v54  ;;  %3262 = vmatpush1.bf16.msra.mxu1 %v3767_v48 }
 0x46b   :  { %3264 = vmatprep.subr.bf16.mxu0 %v3770_v50  ;;  %3268 = vmatprep.subr.bf16.mxu1 %v3780_v60 }
 0x520   :  { %v1610_v11 = vpop.f32.mrb[8].mxu0  ;;  %v1681_v15 = vpop.f32.mrb[16].mxu1 }
 0x521   :  { %v1686_v7 = vadd.f32 %v1610_v11, %v3837_v20  ;;  %v1612_v32 = vpop.f32.mrb[9].mxu0  ;;  %v1683_v16 = vpop.f32.mrb[17].mxu1  ;;  %v1688_v12 = vadd.f32 %v1681_v15, %v3842_v38 }
 0x522   :  { %v1687_v21 = vadd.f32 %v1612_v32, %v3839_v29  ;;  %v1689_v33 = vadd.f32 %v1683_v16, %v3846_v57 }
 0x523   :  { %v1690_v25 = vmul.f32 0.5, %v1686_v7 }
 0x524   :  { %v1694_v30 = vmul.f32 0.5, %v1687_v21  ;;  %v1699_v37 = vmul.f32 0.5, %v1689_v33 }
 0x525   :  { %3518 = vtanh.f32 %v1690_v25 }
 0x526   :  { %3520 = vtanh.f32 %v1694_v30 }
 0x527   :  { %3522 = vtanh.f32 %v1688_v12 }
 0x528   :  { %3524 = vtanh.f32 %v1699_v37 }
 0x52f   :  { %v3519_v41 = vpop.eup %3518 }
 0x530   :  { %v3521_v56 = vpop.eup %3520  ;;  %v1692_v42 = vmul.f32 0.5, %v3519_v41 }
 0x531   :  { %v1696_v45 = vmul.f32 0.5, %v3521_v56  ;;  %v3523_v53 = vpop.eup %3522 }
 0x532   :  { %v1693_v51 = vadd.f32 0.5, %v1692_v42  ;;  %v3525_v11 = vpop.eup %3524 }
 0x533   :  { %v1697_v62 = vadd.f32 0.5, %v1696_v45  ;;  %v1701_v15 = vmul.f32 0.5, %v3525_v11 }
 0x534   :  { %v1704_v63 = vmul.f32 %v3523_v53, %v1693_v51 }
 0x535   :  { %v1703_v2 = vmul.f32 %v1697_v62, %v4008_v47  ;;  %v1702_v7 = vadd.f32 0.5, %v1701_v15  ;;  %v2777_v47 = vld [vmem:[%s4242_s0 + $0x28] sm:$0xff] }
 0x537   :  { %v4061_v24 = vadd.f32 %v1704_v63, %v1703_v2 }
 0x539   :  { %3526 = vtanh.f32 %v4061_v24 }
 0x543   :  { %v3527_v32 = vpop.eup %3526 }
 0x544   :  { %v1707_v16 = vmul.f32 %v3527_v32, %v1702_v7 }
 0x546   :  { %1775 = vmatmul.mubr.f32.vlgmr.msra.gmra.mrb[10].mxu0 %v1707_v16  ;;  %1846 = vmatmul.mubr.f32.vlgmr.msra.gmra.mrb[18].mxu1 %v1707_v16 }
 0x547   :  { %3266 = vmatpush1.bf16.msra.mxu0 %v3777_v59  ;;  %3270 = vmatpush1.bf16.msra.mxu1 %v3790_v3 }
 0x548   :  { %1919 = vmatprep.mubr.f32.mxu0 %v3616_v0  ;;  %1990 = vmatprep.mubr.f32.mxu1 %v3616_v0 }
 0x549   :  { %3272 = vmatprep.subr.bf16.mxu0 %v3684_v9  ;;  %3304 = vmatprep.subr.bf16.mxu1 %v3680_v4 }
 0x54e   :  { %2778 = vmatmul.mubr.msk.f32.vlgmr.msra.gmra.mrb[10].mxu0 %vm274_vm0, %v2777_v47  ;;  %2779 = vmatmul.mubr.msk.f32.vlgmr.msra.gmra.mrb[18].mxu1 %vm274_vm0, %v2777_v47 }
 0x54f   :  { %3274 = vmatpush1.bf16.msra.mxu0 %v3691_v17  ;;  %3306 = vmatpush1.bf16.msra.mxu1 %v3682_v8 }
 0x550   :  { %3276 = vmatprep.subr.bf16.mxu0 %v3696_v22  ;;  %3308 = vmatprep.subr.bf16.mxu1 %v3687_v13 }
 0x551   :  { %2085 = vmatprep.mubr.f32.mxu0 %v3616_v0  ;;  %2156 = vmatprep.mubr.f32.mxu1 %v3616_v0 }
 0x553   :  { %3278 = vmatpush1.bf16.msra.mxu0 %v3701_v27  ;;  %3310 = vmatpush1.bf16.msra.mxu1 %v3693_v18 }
 0x554   :  { %3280 = vmatprep.subr.bf16.mxu0 %v3707_v35  ;;  %3312 = vmatprep.subr.bf16.mxu1 %v3699_v26 }
 0x557   :  { %3282 = vmatpush1.bf16.msra.mxu0 %v3713_v43  ;;  %3314 = vmatpush1.bf16.msra.mxu1 %v3705_v34 }
 0x558   :  { %3284 = vmatprep.subr.bf16.mxu0 %v3716_v46  ;;  %3316 = vmatprep.subr.bf16.mxu1 %v3710_v39 }
 0x55b   :  { %3286 = vmatpush1.bf16.msra.mxu0 %v3725_v55  ;;  %3318 = vmatpush1.bf16.msra.mxu1 %v3719_v49 }
 0x55c   :  { %3288 = vmatprep.subr.bf16.mxu0 %v3728_v58  ;;  %3320 = vmatprep.subr.bf16.mxu1 %v3722_v52 }
 0x55f   :  { %3290 = vmatpush1.bf16.msra.mxu0 %v3737_v5  ;;  %3322 = vmatpush1.bf16.msra.mxu1 %v3731_v61 }
 0x560   :  { %3292 = vmatprep.subr.bf16.mxu0 %v3740_v10  ;;  %3324 = vmatprep.subr.bf16.mxu1 %v3734_v1 }
 0x563   :  { %3294 = vmatpush1.bf16.msra.mxu0 %v3749_v23  ;;  %3326 = vmatpush1.bf16.msra.mxu1 %v3743_v14 }
 0x564   :  { %3296 = vmatprep.subr.bf16.mxu0 %v3752_v28  ;;  %3328 = vmatprep.subr.bf16.mxu1 %v3746_v19 }
 0x567   :  { %3298 = vmatpush1.bf16.msra.mxu0 %v3761_v40  ;;  %3330 = vmatpush1.bf16.msra.mxu1 %v3755_v31 }
 0x568   :  { %3300 = vmatprep.subr.bf16.mxu0 %v3764_v44  ;;  %3332 = vmatprep.subr.bf16.mxu1 %v3758_v36 }
 0x56b   :  { %3302 = vmatpush1.bf16.msra.mxu0 %v3773_v54  ;;  %3334 = vmatpush1.bf16.msra.mxu1 %v3767_v48 }
 0x56c   :  { %3336 = vmatprep.subr.bf16.mxu0 %v3770_v50  ;;  %3340 = vmatprep.subr.bf16.mxu1 %v3780_v60 }
 0x621   :  { %v1921_v21 = vpop.f32.mrb[10].mxu0  ;;  %v1992_v25 = vpop.f32.mrb[18].mxu1 }
 0x622   :  { %v1997_v30 = vadd.f32 %v1921_v21, %v3837_v20  ;;  %v1923_v12 = vpop.f32.mrb[11].mxu0  ;;  %v1994_v33 = vpop.f32.mrb[19].mxu1  ;;  %v1999_v42 = vadd.f32 %v1992_v25, %v3842_v38 }
 0x623   :  { %v1998_v37 = vadd.f32 %v1923_v12, %v3839_v29  ;;  %v2000_v45 = vadd.f32 %v1994_v33, %v3846_v57 }
 0x624   :  { %v2001_v41 = vmul.f32 0.5, %v1997_v30 }
 0x625   :  { %v2005_v56 = vmul.f32 0.5, %v1998_v37  ;;  %v2010_v51 = vmul.f32 0.5, %v2000_v45  ;;  %v2654_v45 = vld [vmem:[%s4246_s4 + $0x40] sm:$0xff] }
 0x626   :  { %3528 = vtanh.f32 %v2001_v41  ;;  %v2652_v41 = vld [vmem:[%s4246_s4 + $0x30] sm:$0xff] }
 0x627   :  { %3530 = vtanh.f32 %v2005_v56  ;;  %v2653_v56 = vld [vmem:[%s4246_s4 + $0x38] sm:$0xff] }
 0x628   :  { %3532 = vtanh.f32 %v1999_v42  ;;  %v3425_v42 = vpack.c.bf16 %v2653_v56, %v2652_v41 }
 0x629   :  { %3534 = vtanh.f32 %v2010_v51  ;;  %v2655_v51 = vld [vmem:[%s4246_s4 + $0x48] sm:$0xff] }
 0x630   :  { %v3529_v53 = vpop.eup %3528 }
 0x631   :  { %v3531_v62 = vpop.eup %3530  ;;  %v2003_v63 = vmul.f32 0.5, %v3529_v53  ;;  %v3428_v53 = vpack.c.bf16 %v2655_v51, %v2654_v45 }
 0x632   :  { %v2007_v2 = vmul.f32 0.5, %v3531_v62  ;;  %v3533_v15 = vpop.eup %3532  ;;  %v2656_v62 = vld [vmem:[%s4246_s4 + $0x50] sm:$0xff] }
 0x633   :  { %v2004_v11 = vadd.f32 0.5, %v2003_v63  ;;  %v3535_v21 = vpop.eup %3534  ;;  %v2657_v63 = vld [vmem:[%s4246_s4 + $0x58] sm:$0xff] }
 0x634   :  { %v2008_v7 = vadd.f32 0.5, %v2007_v2  ;;  %v2012_v25 = vmul.f32 0.5, %v3535_v21  ;;  %v3431_v2 = vpack.c.bf16 %v2657_v63, %v2656_v62 }
 0x635   :  { %v2015_v32 = vmul.f32 %v3533_v15, %v2004_v11  ;;  %v2658_v11 = vld [vmem:[%s4246_s4 + $0x60] sm:$0xff]  ;;  %v2659_v15 = vld [vmem:[%s4246_s4 + $0x68] sm:$0xff] }
 0x636   :  { %v2014_v16 = vmul.f32 %v2008_v7, %v4061_v24  ;;  %v2013_v30 = vadd.f32 0.5, %v2012_v25  ;;  %v2780_v24 = vld [vmem:[%s4242_s0 + $0x30] sm:$0xff]  ;;  %v3434_v7 = vpack.c.bf16 %v2659_v15, %v2658_v11 }
 0x638   :  { %v4114_v47 = vadd.f32 %v2015_v32, %v2014_v16  ;;  %v2660_v32 = vld [vmem:[%s4246_s4 + $0x70] sm:$0xff]  ;;  %v2661_v16 = vld [vmem:[%s4246_s4 + $0x78] sm:$0xff] }
 0x63a   :  { %3536 = vtanh.f32 %v4114_v47 }
 0x644   :  { %v3537_v12 = vpop.eup %3536 }
 0x645   :  { %v2018_v33 = vmul.f32 %v3537_v12, %v2013_v30 }
 0x647   :  { %2086 = vmatmul.mubr.f32.vlgmr.msra.gmra.mrb[12].mxu0 %v2018_v33  ;;  %2157 = vmatmul.mubr.f32.vlgmr.msra.gmra.mrb[20].mxu1 %v2018_v33 }
 0x648   :  { %3338 = vmatpush1.bf16.msra.mxu0 %v3777_v59  ;;  %3342 = vmatpush1.bf16.msra.mxu1 %v3790_v3 }
 0x649   :  { %2230 = vmatprep.mubr.f32.mxu0 %v3616_v0  ;;  %2301 = vmatprep.mubr.f32.mxu1 %v3616_v0 }
 0x64a   :  { %3344 = vmatprep.subr.bf16.mxu0 %v3684_v9  ;;  %3376 = vmatprep.subr.bf16.mxu1 %v3680_v4 }
 0x64f   :  { %2781 = vmatmul.mubr.msk.f32.vlgmr.msra.gmra.mrb[12].mxu0 %vm274_vm0, %v2780_v24  ;;  %2782 = vmatmul.mubr.msk.f32.vlgmr.msra.gmra.mrb[20].mxu1 %vm274_vm0, %v2780_v24 }
 0x650   :  { %3346 = vmatpush1.bf16.msra.mxu0 %v3691_v17  ;;  %3378 = vmatpush1.bf16.msra.mxu1 %v3682_v8 }
 0x651   :  { %3348 = vmatprep.subr.bf16.mxu0 %v3696_v22  ;;  %3380 = vmatprep.subr.bf16.mxu1 %v3687_v13 }
 0x652   :  { %2396 = vmatprep.mubr.f32.mxu0 %v3616_v0  ;;  %2467 = vmatprep.mubr.f32.mxu1 %v3616_v0 }
 0x654   :  { %3350 = vmatpush1.bf16.msra.mxu0 %v3701_v27  ;;  %3382 = vmatpush1.bf16.msra.mxu1 %v3693_v18 }
 0x655   :  { %3352 = vmatprep.subr.bf16.mxu0 %v3707_v35  ;;  %3384 = vmatprep.subr.bf16.mxu1 %v3699_v26 }
 0x658   :  { %3354 = vmatpush1.bf16.msra.mxu0 %v3713_v43  ;;  %3386 = vmatpush1.bf16.msra.mxu1 %v3705_v34 }
 0x659   :  { %3356 = vmatprep.subr.bf16.mxu0 %v3716_v46  ;;  %3388 = vmatprep.subr.bf16.mxu1 %v3710_v39 }
 0x65c   :  { %3358 = vmatpush1.bf16.msra.mxu0 %v3725_v55  ;;  %3390 = vmatpush1.bf16.msra.mxu1 %v3719_v49 }
 0x65d   :  { %3360 = vmatprep.subr.bf16.mxu0 %v3728_v58  ;;  %3392 = vmatprep.subr.bf16.mxu1 %v3722_v52 }
 0x660   :  { %3362 = vmatpush1.bf16.msra.mxu0 %v3737_v5  ;;  %3394 = vmatpush1.bf16.msra.mxu1 %v3731_v61 }
 0x661   :  { %3364 = vmatprep.subr.bf16.mxu0 %v3740_v10  ;;  %3396 = vmatprep.subr.bf16.mxu1 %v3734_v1 }
 0x664   :  { %3366 = vmatpush1.bf16.msra.mxu0 %v3749_v23  ;;  %3398 = vmatpush1.bf16.msra.mxu1 %v3743_v14 }
 0x665   :  { %3368 = vmatprep.subr.bf16.mxu0 %v3752_v28  ;;  %3400 = vmatprep.subr.bf16.mxu1 %v3746_v19 }
 0x668   :  { %3370 = vmatpush1.bf16.msra.mxu0 %v3761_v40  ;;  %3402 = vmatpush1.bf16.msra.mxu1 %v3755_v31  ;;  %v2783_v31 = vld [vmem:[%s4242_s0 + $0x38] sm:$0xff]  ;;  %v2647_v40 = vld [vmem:[%s4246_s4 + $0x8] sm:$0xff] }
 0x669   :  { %3372 = vmatprep.subr.bf16.mxu0 %v3764_v44  ;;  %3404 = vmatprep.subr.bf16.mxu1 %v3758_v36  ;;  %v2646_v36 = vld [vmem:[%s4246_s4] sm:$0xff] }
 0x66a   :  { %v3416_v44 = vpack.c.bf16 %v2647_v40, %v2646_v36 }
 0x66c   :  { %3374 = vmatpush1.bf16.msra.mxu0 %v3773_v54  ;;  %3406 = vmatpush1.bf16.msra.mxu1 %v3767_v48  ;;  %v3617_v48 = vmov 0.0|0.0   ;;  %v2649_v54 = vld [vmem:[%s4246_s4 + $0x18] sm:$0xff] }
 0x66d   :  { %3408 = vmatprep.subr.bf16.mxu0 %v3770_v50  ;;  %3412 = vmatprep.subr.bf16.mxu1 %v3780_v60  ;;  %v2648_v50 = vld [vmem:[%s4246_s4 + $0x10] sm:$0xff]  ;;  %v2650_v60 = vld [vmem:[%s4246_s4 + $0x20] sm:$0xff] }
 0x722   :  { %v2232_v4 = vpop.f32.mrb[12].mxu0  ;;  %v2303_v8 = vpop.f32.mrb[20].mxu1 }
 0x723   :  { %v2308_v9 = vadd.f32 %v2232_v4, %v3837_v20  ;;  %v2234_v13 = vpop.f32.mrb[13].mxu0  ;;  %v2305_v17 = vpop.f32.mrb[21].mxu1  ;;  %v2310_v27 = vadd.f32 %v2303_v8, %v3842_v38 }
 0x724   :  { %v2309_v18 = vadd.f32 %v2234_v13, %v3839_v29  ;;  %v2311_v34 = vadd.f32 %v2305_v17, %v3846_v57 }
 0x725   :  { %v2312_v22 = vmul.f32 0.5, %v2308_v9 }
 0x726   :  { %v2316_v26 = vmul.f32 0.5, %v2309_v18  ;;  %v2321_v35 = vmul.f32 0.5, %v2311_v34 }
 0x727   :  { %3538 = vtanh.f32 %v2312_v22 }
 0x728   :  { %3540 = vtanh.f32 %v2316_v26 }
 0x729   :  { %3542 = vtanh.f32 %v2310_v27 }
 0x72a   :  { %3544 = vtanh.f32 %v2321_v35 }
 0x731   :  { %v3539_v39 = vpop.eup %3538 }
 0x732   :  { %v3541_v43 = vpop.eup %3540  ;;  %v2314_v46 = vmul.f32 0.5, %v3539_v39 }
 0x733   :  { %v2318_v49 = vmul.f32 0.5, %v3541_v43  ;;  %v3543_v55 = vpop.eup %3542 }
 0x734   :  { %v2315_v52 = vadd.f32 0.5, %v2314_v46  ;;  %v3545_v10 = vpop.eup %3544 }
 0x735   :  { %v2319_v58 = vadd.f32 0.5, %v2318_v49  ;;  %v2323_v14 = vmul.f32 0.5, %v3545_v10 }
 0x736   :  { %v2326_v61 = vmul.f32 %v3543_v55, %v2315_v52  ;;  %v2786_v55 = vld [vmem:[%s4247_s5] ss:$0 sm:$0xff] }
 0x737   :  { %v2325_v1 = vmul.f32 %v2319_v58, %v4114_v47  ;;  %v2324_v19 = vadd.f32 0.5, %v2323_v14  ;;  %v3437_v47 = vpack.c.bf16 %v2661_v16, %v2660_v32 }
 0x739   :  { %v4167_v5 = vadd.f32 %v2326_v61, %v2325_v1 }
 0x73b   :  { %3546 = vtanh.f32 %v4167_v5 }
 0x745   :  { %v3547_v23 = vpop.eup %3546 }
 0x746   :  { %v2329_v28 = vmul.f32 %v3547_v23, %v2324_v19 }
 0x748   :  { %2397 = vmatmul.mubr.f32.vlgmr.msra.gmra.mrb[14].mxu0 %v2329_v28  ;;  %2468 = vmatmul.mubr.f32.vlgmr.msra.gmra.mrb[22].mxu1 %v2329_v28 }
 0x749   :  { %3410 = vmatpush1.bf16.msra.mxu0 %v3777_v59  ;;  %3414 = vmatpush1.bf16.msra.mxu1 %v3790_v3  ;;  %v3419_v59 = vpack.c.bf16 %v2649_v54, %v2648_v50  ;;  %v2651_v3 = vld [vmem:[%s4246_s4 + $0x28] sm:$0xff] }
 0x74a   :  { %2541 = vmatprep.mubr.f32.mxu0 %v3616_v0  ;;  %2612 = vmatprep.mubr.f32.mxu1 %v3616_v0  ;;  %v3422_v37 = vpack.c.bf16 %v2651_v3, %v2650_v60 }
 0x74b   :  { %3415 = vmatprep.subr.bf16.mxu0 %v3617_v48 }
 0x750   :  { %2784 = vmatmul.mubr.msk.f32.vlgmr.msra.gmra.mrb[14].mxu0 %vm274_vm0, %v2783_v31  ;;  %2785 = vmatmul.mubr.msk.f32.vlgmr.msra.gmra.mrb[22].mxu1 %vm274_vm0, %v2783_v31 }
 0x751   :  { %3417 = vmatpush3.bf16.msra.mxu0 %v3416_v44  ;;  %2836 = vmatprep.mubr.msk.f32.mxu0 %vm3618_vm1, %v3616_v0 }
 0x752   :  { %3418 = vmatprep.subr.bf16.mxu0 %v3617_v48 }
 0x755   :  { %3420 = vmatpush3.bf16.msra.mxu0 %v3419_v59 }
 0x756   :  { %3421 = vmatprep.subr.bf16.mxu0 %v3617_v48 }
 0x759   :  { %3423 = vmatpush3.bf16.msra.mxu0 %v3422_v37 }
 0x75a   :  { %3424 = vmatprep.subr.bf16.mxu0 %v3617_v48 }
 0x75d   :  { %3426 = vmatpush3.bf16.msra.mxu0 %v3425_v42 }
 0x75e   :  { %3427 = vmatprep.subr.bf16.mxu0 %v3617_v48 }
 0x761   :  { %3429 = vmatpush3.bf16.msra.mxu0 %v3428_v53 }
 0x762   :  { %3430 = vmatprep.subr.bf16.mxu0 %v3617_v48 }
 0x765   :  { %3432 = vmatpush3.bf16.msra.mxu0 %v3431_v2 }
 0x766   :  { %3433 = vmatprep.subr.bf16.mxu0 %v3617_v48 }
 0x769   :  { %3435 = vmatpush3.bf16.msra.mxu0 %v3434_v7 }
 0x76a   :  { %3436 = vmatprep.subr.bf16.mxu0 %v3617_v48 }
 0x76d   :  { %3438 = vmatpush3.bf16.msra.mxu0 %v3437_v47 }
 0x823   :  { %v2543_v21 = vpop.f32.mrb[14].mxu0  ;;  %v2614_v25 = vpop.f32.mrb[22].mxu1 }
 0x824   :  { %v2619_v30 = vadd.f32 %v2543_v21, %v3837_v20  ;;  %v2545_v12 = vpop.f32.mrb[15].mxu0  ;;  %v2616_v33 = vpop.f32.mrb[23].mxu1  ;;  %v2621_v9 = vadd.f32 %v2614_v25, %v3842_v38 }
 0x825   :  { %v2620_v24 = vadd.f32 %v2545_v12, %v3839_v29  ;;  %v2622_v13 = vadd.f32 %v2616_v33, %v3846_v57  ;;  %v2740_v57 = vand.u32 127, %v422_v6 }
 0x826   :  { %v2623_v4 = vmul.f32 0.5, %v2619_v30 }
 0x827   :  { %v2627_v8 = vmul.f32 0.5, %v2620_v24  ;;  %v2632_v17 = vmul.f32 0.5, %v2622_v13  ;;  %vm2741_vm2 = vcmp.lt.s32.totalorder %v2740_v57, 16  ;;  %vm2753_vm3 = vcmp.eq.s32.totalorder %v2740_v57, 16 }
 0x828   :  { %3548 = vtanh.f32 %v2623_v4 }
 0x829   :  { %3550 = vtanh.f32 %v2627_v8 }
 0x82a   :  { %3552 = vtanh.f32 %v2621_v9 }
 0x82b   :  { %3554 = vtanh.f32 %v2632_v17 }
 0x832   :  { %v3549_v18 = vpop.eup %3548 }
 0x833   :  { %v3551_v0 = vpop.eup %3550  ;;  %v2625_v22 = vmul.f32 0.5, %v3549_v18 }
 0x834   :  { %v2629_v26 = vmul.f32 0.5, %v3551_v0  ;;  %v3553_v27 = vpop.eup %3552 }
 0x835   :  { %v2626_v20 = vadd.f32 0.5, %v2625_v22  ;;  %v3555_v43 = vpop.eup %3554 }
 0x836   :  { %v2630_v34 = vadd.f32 0.5, %v2629_v26  ;;  %v2634_v38 = vmul.f32 0.5, %v3555_v43 }
 0x837   :  { %v2637_v35 = vmul.f32 %v3553_v27, %v2626_v20 }
 0x838   :  { %v2636_v29 = vmul.f32 %v2630_v34, %v4167_v5  ;;  %v2635_v46 = vadd.f32 0.5, %v2634_v38 }
 0x83a   :  { %v2638_v39 = vadd.f32 %v2637_v35, %v2636_v29 }
 0x83c   :  { %3556 = vtanh.f32 %v2638_v39 }
 0x846   :  { %v3557_v49 = vpop.eup %3556 }
 0x847   :  { %v2640_v52 = vmul.f32 %v3557_v49, %v2635_v46 }
 0x849   :  { %2837 = vmatmul.mubr.f32.vlgmr.msra.gmra.mrb[16].mxu0 %v2640_v52 }
 0x91c   :  { %v2735_v58 = vpop.f32.mrb[16].mxu0 }
 0x91d   :  { %v2736_v61 = vadd.f32 %v2786_v55, %v2735_v58  ;;  %v2838_v1 = vpop.f32.mrb[17].mxu0 }
 0x91f   :  { %3558 = vtanh.f32 %v2736_v61  ;;  %v2742_v5 = vsel %vm2741_vm2, %v2736_v61, -1e+30 }
 0x920   :  { %2743 = vmax.xlane.f32.xlu0 %v2742_v5 }
 0x929   :  { %v3559_v10 = vpop.eup %3558 }
 0x92a   :  { %v2754_v14 = vsel %vm2753_vm3, %v3559_v10, 0.0 }
 0x9ad   :  { %v2744_v19 = vpop.xlane.xlu0 %2743 }
 0x9ae   :  { %v2745_v23 = vsub.f32 %v2742_v5, %v2744_v19 }
 0x9b0   :  { %v2746_v28 = vmul.f32 1.442695, %v2745_v23 }
 0x9b2   :  { %3560 = vpow2.f32 %v2746_v28 }
 0x9bc   :  { %v3561_v6 = vpop.eup %3560 }
 0x9bd   :  { %2748 = vadd.xlane.f32.xlu0 %v3561_v6 }
 0xa4a   :  { %v2749_v31 = vpop.xlane.xlu0 %2748 }
 0xa4b   :  { %3562 = vrcp.f32 %v2749_v31 }
 0xa55   :  { %v3563_v36 = vpop.eup %3562 }
 0xa56   :  { %v2751_v40 = vmul.f32 %v3563_v36, %v3561_v6 }
 0xa58   :  { %v2755_v44 = vsel %vm2741_vm2, %v2751_v40, %v2754_v14 }
 0xa59   :  { %2756 = vst [vmem:[%s4248_s6] sm:$0xff] %v2755_v44 }
 0xa5a   :  { %2761 = vsyncpa [#allocation5], 1 }
 0xa5b   :  { %2762 = vsyncpa [#allocation7], 1 }

</bundles_post_ra>
